<compile_context>
chip_gen: v7x
topology: tpu7x:2x2x1
jax: 0.10.0
libtpu: 0.0.40
codegen_flags: <defaults>
</compile_context>

<pallas_src>
import math
import functools

import jax
import jax.numpy as jnp
from jax.experimental import pallas as pl
from jax.experimental.pallas import tpu as pltpu


def _round_up(a, b):
    return (a + b - 1) // b * b


# ----------------------------- shared math helpers -----------------------------

def _layer_norm(x, g, b, eps=1e-5):
    # Single-pass statistics: E[x] and E[x^2] computed together (one fewer
    # cross-lane XLU reduction than the two-pass form); rsqrt runs on the EUP.
    mu = jnp.mean(x, axis=-1, keepdims=True)
    ms = jnp.mean(x * x, axis=-1, keepdims=True)
    var = ms - mu * mu
    return (x - mu) * jax.lax.rsqrt(var + eps) * g + b


def _activation(name, x, *, fast_gelu=False):
    if name == "relu":
        return jnp.maximum(x, 0.0)
    if name == "leakyrelu":
        # ACTIVATION_DICT uses negative_slope=0.1 (not PyTorch's 0.01 default).
        return jnp.where(x > 0, x, 0.1 * x)
    if name == "gelu":
        # tanh approximation inside the kernel -> EUP slot instead of a long
        # VALU erf polynomial; exact erf in the pure-JAX reference.
        return jax.nn.gelu(x, approximate=fast_gelu)
    if name is None:
        return x
    raise ValueError(f"unknown activation {name}")


# ---------------------------------- kernel ----------------------------------

def _mlp_kernel(kdescs, x_ref, *refs):
    """kdescs: tuple of per-layer dicts
         {'dim': int, 'bias_row': int|None, 'ln_g_row': int|None,
          'ln_b_row': int|None, 'act': str|None}.

    refs = per-layer weights (bf16, pre-transposed (in,out), full block, constant
    index_map), then one packed f32 epilogue-param array, then out_ref.
    """
    out_ref = refs[-1]
    ep = refs[-2][...]                      # (P, EP_LANES) f32: all biases/LN params
    w_refs = refs[:-2]

    h = x_ref[...]                          # (TM, D_in) bf16 MXU operand
    n_layers = len(kdescs)
    y = None
    for li, d in enumerate(kdescs):
        w = w_refs[li][...]                 # (D_prev, D_next) bf16
        y = jnp.dot(h, w, preferred_element_type=jnp.float32)   # f32 accumulate
        dim = d["dim"]
        if d["bias_row"] is not None:
            y = y + ep[d["bias_row"]:d["bias_row"] + 1, :dim]
        if d["ln_g_row"] is not None:
            g = ep[d["ln_g_row"]:d["ln_g_row"] + 1, :dim]
            b = ep[d["ln_b_row"]:d["ln_b_row"] + 1, :dim]
            y = _layer_norm(y, g, b)
        y = _activation(d["act"], y, fast_gelu=True)
        if li + 1 < n_layers:
            h = y.astype(jnp.bfloat16)      # next layer's MXU operand
    out_ref[...] = y.astype(out_ref.dtype)  # lane-dense (128-multiple) bf16 store


# ------------------------------ param preparation ------------------------------

def prepare_generic_mlp(layer_params, descs, *, use_conv=False):
    """One-time layout plumbing (hoisted out of the hot path):
       - squeeze Conv1d(k=1) weights (out,in,1) -> (out,in),
       - transpose weights to (in,out) and cast to bf16 (no per-step XLU .T),
       - zero-pad the FINAL layer's output features to a multiple of 128 so the
         kernel's store is lane-dense (skipped if that layer has LayerNorm),
       - pack every bias / ln_gamma / ln_beta into one (P, EP_LANES) f32 array.
    """
    if use_conv and any(d["norm"] == "ln" for d in descs):
        # TODO(synk): use_conv + 'ln' maps to GroupNorm(1, C) over (C, L) per
        # sample in the PyTorch module; no per-row Pallas equivalent here.
        raise NotImplementedError("use_conv with 'ln' (GroupNorm) not supported")

    n_layers = len(descs)
    weights, kdescs = [], []
    ep_rows = []          # list of (vector, width) to pack

    dims = []
    for li, (d, lp) in enumerate(zip(descs, layer_params)):
        w = jnp.asarray(lp["w"], jnp.float32)
        if w.ndim == 3:                                  # Conv1d kernel (out,in,1)
            w = w[..., 0]
        d_out, d_in = w.shape

        is_last = li == n_layers - 1
        pad_ok = is_last and d["norm"] != "ln"           # padding safe (no LN stats)
        d_out_pad = _round_up(d_out, 128) if pad_ok else d_out
        if d_out_pad != d_out:
            w = jnp.pad(w, ((0, d_out_pad - d_out), (0, 0)))

        weights.append(w.T.astype(jnp.bfloat16))         # (in, out) bf16
        kd = {"dim": d_out_pad, "bias_row": None, "ln_g_row": None,
              "ln_b_row": None, "act": d["act"]}

        if d["bias"]:
            kd["bias_row"] = len(ep_rows)
            ep_rows.append((jnp.asarray(lp["b"], jnp.float32), d_out_pad))
        if d["norm"] == "ln":
            kd["ln_g_row"] = len(ep_rows)
            ep_rows.append((jnp.asarray(lp["ln_g"], jnp.float32), d_out_pad))
            kd["ln_b_row"] = len(ep_rows)
            ep_rows.append((jnp.asarray(lp["ln_b"], jnp.float32), d_out_pad))

        kdescs.append(kd)
        dims.append(d_out_pad)
        last_true_out = d_out

    ep_lanes = _round_up(max(dims + [1]), 128)
    if ep_rows:
        ep = jnp.stack([jnp.pad(v, (0, ep_lanes - v.shape[0])) for v, _ in ep_rows])
    else:
        ep = jnp.zeros((1, ep_lanes), jnp.float32)

    return {
        "weights": weights,
        "ep": ep,
        "kdescs": tuple(kdescs),
        "d_in": weights[0].shape[0],
        "d_out": last_true_out,
        "d_out_pad": dims[-1],
    }


# --------------------------------- wrapper ---------------------------------

def generic_mlp(x, prepared, *, use_conv=False, block_rows=256,
                out_dtype=jnp.bfloat16):
    """Pallas forward for GenericMLP.

    x: (..., D_in) for the Linear path, or (B, C, L) for the Conv1d(k=1) path.
    prepared: output of prepare_generic_mlp (weights/params already laid out).
    Note: output dtype defaults to bf16 (halves HBM writeback); pass
    out_dtype=jnp.float32 if the consumer needs f32 end-to-end.
    """
    d_in = prepared["d_in"]
    d_out = prepared["d_out"]
    d_out_pad = prepared["d_out_pad"]
    weights = prepared["weights"]
    ep = prepared["ep"]
    kdescs = prepared["kdescs"]

    if use_conv:
        B, C, L = x.shape
        x2 = jnp.transpose(x, (0, 2, 1)).reshape(B * L, C)   # Conv1d k=1 == Linear
    else:
        lead = x.shape[:-1]
        x2 = x.reshape(-1, x.shape[-1])

    N = x2.shape[0]
    # Big row tiles (multiple of 16 for bf16 sublane packing), but never pad a
    # tiny N up to block_rows.  For N > block_rows the grid automatically has
    # >= 2 steps, so "parallel" can shard across v7x's two TensorCores.
    eff_rows = max(16, min(_round_up(block_rows, 16), _round_up(N, 16)))
    N_pad = _round_up(N, eff_rows)
    if N_pad != N:
        x2 = jnp.pad(x2, ((0, N_pad - N), (0, 0)))
    x2 = x2.astype(jnp.bfloat16)

    grid = (N_pad // eff_rows,)

    out_itemsize = jnp.dtype(out_dtype).itemsize
    w_bytes = sum(int(w.size) * 2 for w in weights)
    ep_bytes = int(ep.size) * 4
    in_tile_bytes = eff_rows * d_in * 2
    out_tile_bytes = eff_rows * d_out_pad * out_itemsize
    # Double-buffered I/O tiles + (still double-buffered) resident weights + slack.
    needed = 2 * (in_tile_bytes + out_tile_bytes) + 2 * (w_bytes + ep_bytes) + (4 << 20)
    vmem_limit = min(needed, 64 << 20) if needed > (32 << 20) else None

    flops = 2 * N_pad * sum(int(w.shape[0]) * int(w.shape[1]) for w in weights)
    transcendentals = sum(
        (N_pad * d["dim"] if d["act"] == "gelu" else 0)
        + (N_pad if d["ln_g_row"] is not None else 0)
        for d in kdescs)
    bytes_accessed = (int(x2.size) * 2 + N_pad * d_out_pad * out_itemsize
                      + w_bytes + ep_bytes)
    cost = pl.CostEstimate(flops=int(flops),
                           transcendentals=int(transcendentals),
                           bytes_accessed=int(bytes_accessed))

    # Constant index_map -> weights/params stay resident across grid steps.
    param_specs = ([pl.BlockSpec(w.shape, lambda i: (0, 0)) for w in weights]
                   + [pl.BlockSpec(ep.shape, lambda i: (0, 0))])

    out = pl.pallas_call(
        functools.partial(_mlp_kernel, kdescs),
        out_shape=jax.ShapeDtypeStruct((N_pad, d_out_pad), out_dtype),
        grid=grid,
        in_specs=[pl.BlockSpec((eff_rows, d_in), lambda i: (i, 0))] + param_specs,
        out_specs=pl.BlockSpec((eff_rows, d_out_pad), lambda i: (i, 0)),
        compiler_params=pltpu.CompilerParams(
            dimension_semantics=("parallel",),       # shard row tiles across TCs
            vmem_limit_bytes=vmem_limit),
        cost_estimate=cost,
    )(x2, *weights, ep)

    out = out[:N, :d_out]
    if use_conv:
        return jnp.transpose(out.reshape(B, L, d_out), (0, 2, 1))
    return out.reshape(*lead, d_out)


# ------------------------------ pure-JAX reference ------------------------------
# Faithful f32 re-implementation of GenericMLP.forward (PyTorch layout/semantics).

def generic_mlp_ref(x, layer_params, descs, *, use_conv=False):
    if use_conv:
        B, C, L = x.shape
        h = jnp.transpose(x, (0, 2, 1)).reshape(B * L, C)
    else:
        lead = x.shape[:-1]
        h = x.reshape(-1, x.shape[-1])
    for d, lp in zip(descs, layer_params):
        w = jnp.asarray(lp["w"], jnp.float32)
        if w.ndim == 3:
            w = w[..., 0]
        h = h @ w.T
        if d["bias"]:
            h = h + jnp.asarray(lp["b"], jnp.float32)
        if d["norm"] == "ln":
            mu = jnp.mean(h, axis=-1, keepdims=True)
            var = jnp.mean((h - mu) ** 2, axis=-1, keepdims=True)
            h = (h - mu) * jax.lax.rsqrt(var + 1e-5)
            h = h * jnp.asarray(lp["ln_g"], jnp.float32) + jnp.asarray(lp["ln_b"], jnp.float32)
        h = _activation(d["act"], h, fast_gelu=False)
    D_out = h.shape[-1]
    if use_conv:
        return jnp.transpose(h.reshape(B, L, D_out), (0, 2, 1))
    return h.reshape(*lead, D_out)


# --------------------------------- params init ---------------------------------

def _xavier(key, shape):
    # fan computed as for nn.Linear / Conv1d(k=1): (out, in[, 1])
    fan_out, fan_in = shape[0], shape[1]
    lim = math.sqrt(6.0 / (fan_in + fan_out))
    return jax.random.uniform(key, shape, jnp.float32, -lim, lim)


def init_generic_mlp(key, input_dim, hidden_dims, output_dim,
                     norm_fn_name="ln", activation="relu",
                     hidden_use_bias=False, output_use_bias=True,
                     output_use_norm=False, output_use_activation=False,
                     use_conv=False):
    """Mirrors GenericMLP.__init__ (weight_init_name='xavier_uniform')."""
    # TODO(synk): nn.Dropout is an inference no-op and nn.BatchNorm1d (training-mode
    # batch statistics) has no clean single-example Pallas equivalent; only
    # 'ln'/identity norms are implemented.
    descs, layer_params = [], []
    dims = [input_dim] + list(hidden_dims)
    keys = jax.random.split(key, 2 * (len(hidden_dims) + 1))
    ki = 0
    wshape = (lambda o, i: (o, i, 1)) if use_conv else (lambda o, i: (o, i))
    for i in range(len(hidden_dims)):
        d_in, d_o = dims[i], dims[i + 1]
        lp = {"w": _xavier(keys[ki], wshape(d_o, d_in))}
        ki += 1
        if hidden_use_bias:
            lp["b"] = 0.02 * jax.random.normal(keys[ki], (d_o,), jnp.float32)
        ki += 1
        desc = {"bias": hidden_use_bias, "norm": None, "act": activation}
        if norm_fn_name == "ln" and not use_conv:
            lp["ln_g"] = jnp.ones((d_o,), jnp.float32)
            lp["ln_b"] = jnp.zeros((d_o,), jnp.float32)
            desc["norm"] = "ln"
        layer_params.append(lp)
        descs.append(desc)
    # output layer
    lp = {"w": _xavier(keys[ki], wshape(output_dim, dims[-1]))}
    ki += 1
    if output_use_bias:
        lp["b"] = 0.02 * jax.random.normal(keys[ki], (output_dim,), jnp.float32)
    desc = {"bias": output_use_bias, "norm": None,
            "act": activation if output_use_activation else None}
    if output_use_norm and norm_fn_name == "ln" and not use_conv:
        lp["ln_g"] = jnp.ones((output_dim,), jnp.float32)
        lp["ln_b"] = jnp.zeros((output_dim,), jnp.float32)
        desc["norm"] = "ln"
    layer_params.append(lp)
    descs.append(desc)
    return layer_params, descs


# ------------------------------------ main ------------------------------------

if __name__ == "__main__":
    key = jax.random.PRNGKey(0)
    k_x, k_p, k_xc, k_pc = jax.random.split(key, 4)

    # --- Linear path ---------------------------------------------------------
    # GenericMLP(input_dim=32, hidden_dims=[64, 64], output_dim=32,
    #            norm_fn_name='ln', activation='relu', use_conv=False,
    #            hidden_use_bias=False, output_use_bias=True,
    #            weight_init_name='xavier_uniform'), dropout=None (eval no-op).
    B, S, D_IN, HID, D_OUT = 2, 256, 32, 64, 32
    x = jax.random.normal(k_x, (B, S, D_IN), jnp.float32)

    layer_params, descs = init_generic_mlp(
        k_p, D_IN, [HID, HID], D_OUT,
        norm_fn_name="ln", activation="relu",
        hidden_use_bias=False, output_use_bias=True)

    prepared = prepare_generic_mlp(layer_params, descs, use_conv=False)
    out = generic_mlp(x, prepared, use_conv=False, block_rows=256)
    out = jax.block_until_ready(out)

    ref = generic_mlp_ref(x, layer_params, descs, use_conv=False)
    max_err = float(jnp.max(jnp.abs(out.astype(jnp.float32) - ref)))
    # Tolerance is loose because MXU operands / inter-layer activations / output
    # run in bf16 (f32 accumulation + f32 LN/bias/activation epilogues).
    assert max_err < 1e-1, f"linear path mismatch vs reference: {max_err}"

    # --- Conv1d(k=1) path ----------------------------------------------------
    Bc, C_IN, Lc, HIDC, C_OUT = 2, 8, 24, 32, 8
    xc = jax.random.normal(k_xc, (Bc, C_IN, Lc), jnp.float32)

    layer_params_c, descs_c = init_generic_mlp(
        k_pc, C_IN, [HIDC, HIDC], C_OUT,
        norm_fn_name=None, activation="gelu",
        hidden_use_bias=True, output_use_bias=True, use_conv=True)

    prepared_c = prepare_generic_mlp(layer_params_c, descs_c, use_conv=True)
    out_c = generic_mlp(xc, prepared_c, use_conv=True, block_rows=256)
    out_c = jax.block_until_ready(out_c)

    ref_c = generic_mlp_ref(xc, layer_params_c, descs_c, use_conv=True)
    max_err_c = float(jnp.max(jnp.abs(out_c.astype(jnp.float32) - ref_c)))
    assert max_err_c < 1e-1, f"conv path mismatch vs reference: {max_err_c}"

    print("KERNEL_OK")
</pallas_src>

<mosaic_0001>
module attributes {stable_mosaic.version = 11 : i64} {
  func.func @_mlp_kernel(%arg0: i32, %arg1: memref<256x32xbf16, #tpu.memory_space<vmem>>, %arg2: memref<32x64xbf16, #tpu.memory_space<vmem>>, %arg3: memref<64x64xbf16, #tpu.memory_space<vmem>>, %arg4: memref<64x128xbf16, #tpu.memory_space<vmem>>, %arg5: memref<5x128xf32, #tpu.memory_space<vmem>>, %arg6: memref<256x128xbf16, #tpu.memory_space<vmem>>) attributes {dimension_semantics = [#tpu.dimension_semantics<parallel>], iteration_bounds = array<i64: 2>, scalar_prefetch = 0 : i64, scratch_operands = 0 : i64, tpu.core_type = #tpu.core_type<tc>, window_params = [{transform_indices = @transform_0, window_bounds = array<i64: 256, 32>}, {pipeline_mode = #tpu.pipeline_mode<synchronous>, transform_indices = @transform_1, window_bounds = array<i64: 32, 64>}, {pipeline_mode = #tpu.pipeline_mode<synchronous>, transform_indices = @transform_2, window_bounds = array<i64: 64, 64>}, {pipeline_mode = #tpu.pipeline_mode<synchronous>, transform_indices = @transform_3, window_bounds = array<i64: 64, 128>}, {pipeline_mode = #tpu.pipeline_mode<synchronous>, transform_indices = @transform_4, window_bounds = array<i64: 5, 128>}, {transform_indices = @transform_5, window_bounds = array<i64: 256, 128>}]} {
    %c0 = arith.constant 0 : index
    %c0_0 = arith.constant 0 : index
    %0 = vector.load %arg5[%c0, %c0_0] : memref<5x128xf32, #tpu.memory_space<vmem>>, vector<5x128xf32>
    %c0_1 = arith.constant 0 : index
    %c0_2 = arith.constant 0 : index
    %1 = vector.load %arg1[%c0_1, %c0_2] : memref<256x32xbf16, #tpu.memory_space<vmem>>, vector<256x32xbf16>
    %c0_3 = arith.constant 0 : index
    %c0_4 = arith.constant 0 : index
    %2 = vector.load %arg2[%c0_3, %c0_4] : memref<32x64xbf16, #tpu.memory_space<vmem>>, vector<32x64xbf16>
    %cst = arith.constant dense<0.000000e+00> : vector<256x64xf32>
    %3 = tpu.matmul %1, %2, %cst {dimension_numbers = #tpu.dot_dimension_numbers<[1], [0], [0], [1], [0, 0, 1, 1], [], []>} : vector<256x32xbf16>, vector<32x64xbf16>, vector<256x64xf32> -> vector<256x64xf32>
    %4 = vector.extract_strided_slice %0 {offsets = [0, 0], sizes = [1, 64], strides = [1, 1]} : vector<5x128xf32> to vector<1x64xf32>
    %5 = vector.extract_strided_slice %0 {offsets = [1, 0], sizes = [1, 64], strides = [1, 1]} : vector<5x128xf32> to vector<1x64xf32>
    %cst_5 = arith.constant dense<0.000000e+00> : vector<256xf32>
    %6 = vector.multi_reduction <add>, %3, %cst_5 [1] : vector<256x64xf32> to vector<256xf32>
    %7 = vector.shape_cast %6 : vector<256xf32> to vector<256x1xf32>
    %cst_6 = arith.constant 6.400000e+01 : f32
    %8 = vector.broadcast %cst_6 : f32 to vector<256x1xf32>
    %9 = arith.divf %7, %8 : vector<256x1xf32>
    %10 = arith.mulf %3, %3 : vector<256x64xf32>
    %cst_7 = arith.constant dense<0.000000e+00> : vector<256xf32>
    %11 = vector.multi_reduction <add>, %10, %cst_7 [1] : vector<256x64xf32> to vector<256xf32>
    %12 = vector.shape_cast %11 : vector<256xf32> to vector<256x1xf32>
    %cst_8 = arith.constant 6.400000e+01 : f32
    %13 = vector.broadcast %cst_8 : f32 to vector<256x1xf32>
    %14 = arith.divf %12, %13 : vector<256x1xf32>
    %15 = arith.mulf %9, %9 : vector<256x1xf32>
    %16 = arith.subf %14, %15 : vector<256x1xf32>
    %17 = vector.broadcast %9 : vector<256x1xf32> to vector<256x64xf32>
    %18 = arith.subf %3, %17 : vector<256x64xf32>
    %cst_9 = arith.constant 9.99999974E-6 : f32
    %19 = vector.broadcast %cst_9 : f32 to vector<256x1xf32>
    %20 = arith.addf %16, %19 : vector<256x1xf32>
    %21 = math.rsqrt %20 : vector<256x1xf32>
    %22 = vector.broadcast %21 : vector<256x1xf32> to vector<256x64xf32>
    %23 = arith.mulf %18, %22 : vector<256x64xf32>
    %24 = vector.broadcast %4 : vector<1x64xf32> to vector<256x64xf32>
    %25 = arith.mulf %23, %24 : vector<256x64xf32>
    %26 = vector.broadcast %5 : vector<1x64xf32> to vector<256x64xf32>
    %27 = arith.addf %25, %26 : vector<256x64xf32>
    %cst_10 = arith.constant 0.000000e+00 : f32
    %28 = vector.broadcast %cst_10 : f32 to vector<256x64xf32>
    %29 = arith.maximumf %27, %28 : vector<256x64xf32>
    %30 = arith.truncf %29 : vector<256x64xf32> to vector<256x64xbf16>
    %c0_11 = arith.constant 0 : index
    %c0_12 = arith.constant 0 : index
    %31 = vector.load %arg3[%c0_11, %c0_12] : memref<64x64xbf16, #tpu.memory_space<vmem>>, vector<64x64xbf16>
    %cst_13 = arith.constant dense<0.000000e+00> : vector<256x64xf32>
    %32 = tpu.matmul %30, %31, %cst_13 {dimension_numbers = #tpu.dot_dimension_numbers<[1], [0], [0], [1], [0, 0, 1, 1], [], []>} : vector<256x64xbf16>, vector<64x64xbf16>, vector<256x64xf32> -> vector<256x64xf32>
    %33 = vector.extract_strided_slice %0 {offsets = [2, 0], sizes = [1, 64], strides = [1, 1]} : vector<5x128xf32> to vector<1x64xf32>
    %34 = vector.extract_strided_slice %0 {offsets = [3, 0], sizes = [1, 64], strides = [1, 1]} : vector<5x128xf32> to vector<1x64xf32>
    %cst_14 = arith.constant dense<0.000000e+00> : vector<256xf32>
    %35 = vector.multi_reduction <add>, %32, %cst_14 [1] : vector<256x64xf32> to vector<256xf32>
    %36 = vector.shape_cast %35 : vector<256xf32> to vector<256x1xf32>
    %cst_15 = arith.constant 6.400000e+01 : f32
    %37 = vector.broadcast %cst_15 : f32 to vector<256x1xf32>
    %38 = arith.divf %36, %37 : vector<256x1xf32>
    %39 = arith.mulf %32, %32 : vector<256x64xf32>
    %cst_16 = arith.constant dense<0.000000e+00> : vector<256xf32>
    %40 = vector.multi_reduction <add>, %39, %cst_16 [1] : vector<256x64xf32> to vector<256xf32>
    %41 = vector.shape_cast %40 : vector<256xf32> to vector<256x1xf32>
    %cst_17 = arith.constant 6.400000e+01 : f32
    %42 = vector.broadcast %cst_17 : f32 to vector<256x1xf32>
    %43 = arith.divf %41, %42 : vector<256x1xf32>
    %44 = arith.mulf %38, %38 : vector<256x1xf32>
    %45 = arith.subf %43, %44 : vector<256x1xf32>
    %46 = vector.broadcast %38 : vector<256x1xf32> to vector<256x64xf32>
    %47 = arith.subf %32, %46 : vector<256x64xf32>
    %cst_18 = arith.constant 9.99999974E-6 : f32
    %48 = vector.broadcast %cst_18 : f32 to vector<256x1xf32>
    %49 = arith.addf %45, %48 : vector<256x1xf32>
    %50 = math.rsqrt %49 : vector<256x1xf32>
    %51 = vector.broadcast %50 : vector<256x1xf32> to vector<256x64xf32>
    %52 = arith.mulf %47, %51 : vector<256x64xf32>
    %53 = vector.broadcast %33 : vector<1x64xf32> to vector<256x64xf32>
    %54 = arith.mulf %52, %53 : vector<256x64xf32>
    %55 = vector.broadcast %34 : vector<1x64xf32> to vector<256x64xf32>
    %56 = arith.addf %54, %55 : vector<256x64xf32>
    %cst_19 = arith.constant 0.000000e+00 : f32
    %57 = vector.broadcast %cst_19 : f32 to vector<256x64xf32>
    %58 = arith.maximumf %56, %57 : vector<256x64xf32>
    %59 = arith.truncf %58 : vector<256x64xf32> to vector<256x64xbf16>
    %c0_20 = arith.constant 0 : index
    %c0_21 = arith.constant 0 : index
    %60 = vector.load %arg4[%c0_20, %c0_21] : memref<64x128xbf16, #tpu.memory_space<vmem>>, vector<64x128xbf16>
    %cst_22 = arith.constant dense<0.000000e+00> : vector<256x128xf32>
    %61 = tpu.matmul %59, %60, %cst_22 {dimension_numbers = #tpu.dot_dimension_numbers<[1], [0], [0], [1], [0, 0, 1, 1], [], []>} : vector<256x64xbf16>, vector<64x128xbf16>, vector<256x128xf32> -> vector<256x128xf32>
    %62 = vector.extract_strided_slice %0 {offsets = [4, 0], sizes = [1, 128], strides = [1, 1]} : vector<5x128xf32> to vector<1x128xf32>
    %63 = vector.broadcast %62 : vector<1x128xf32> to vector<256x128xf32>
    %64 = arith.addf %61, %63 : vector<256x128xf32>
    %65 = arith.truncf %64 : vector<256x128xf32> to vector<256x128xbf16>
    %c0_23 = arith.constant 0 : index
    %c0_24 = arith.constant 0 : index
    %66 = vector.load %arg6[%c0_23, %c0_24] : memref<256x128xbf16, #tpu.memory_space<vmem>>, vector<256x128xbf16>
    tpu.vector_store %arg6[%c0_23, %c0_24], %65 {strides = array<i32>} : memref<256x128xbf16, #tpu.memory_space<vmem>>, vector<256x128xbf16>,
    return
  }
  func.func @transform_0(%arg0: i32) -> (i32, i32) {
    %c0_i32 = arith.constant 0 : i32
    %c0_i32_0 = arith.constant 0 : i32
    return %arg0, %c0_i32 : i32, i32
  }
  func.func @transform_1(%arg0: i32) -> (i32, i32) {
    %c0_i32 = arith.constant 0 : i32
    %c0_i32_0 = arith.constant 0 : i32
    %c0_i32_1 = arith.constant 0 : i32
    return %c0_i32, %c0_i32_0 : i32, i32
  }
  func.func @transform_2(%arg0: i32) -> (i32, i32) {
    %c0_i32 = arith.constant 0 : i32
    %c0_i32_0 = arith.constant 0 : i32
    %c0_i32_1 = arith.constant 0 : i32
    return %c0_i32, %c0_i32_0 : i32, i32
  }
  func.func @transform_3(%arg0: i32) -> (i32, i32) {
    %c0_i32 = arith.constant 0 : i32
    %c0_i32_0 = arith.constant 0 : i32
    %c0_i32_1 = arith.constant 0 : i32
    return %c0_i32, %c0_i32_0 : i32, i32
  }
  func.func @transform_4(%arg0: i32) -> (i32, i32) {
    %c0_i32 = arith.constant 0 : i32
    %c0_i32_0 = arith.constant 0 : i32
    %c0_i32_1 = arith.constant 0 : i32
    return %c0_i32, %c0_i32_0 : i32, i32
  }
  func.func @transform_5(%arg0: i32) -> (i32, i32) {
    %c0_i32 = arith.constant 0 : i32
    %c0_i32_0 = arith.constant 0 : i32
    return %arg0, %c0_i32 : i32, i32
  }
}

</mosaic_0001>

<bundles_post_ra>
// kernel: tpu_custom_call.1
= control target key start
LH: loop header
LB: loop body
LE: loop exit
PB: predicated region body
PF: predicated region fallthrough
CT: control target
= control target key end

     0   :  { %10 = vsyncpa [#allocation3], 0  ;;  %s4418_s0 = inlined_call_operand.vmem [shape: bf16[512,32], index: 0, kind: input, shape index: {}]   ;;  %s4419_s1 = inlined_call_operand.vmem [shape: bf16[32,64], index: 1, kind: input, shape index: {}]   ;;  %s4420_s2 = inlined_call_operand.vmem [shape: bf16[64,64], index: 2, kind: input, shape index: {}]   ;;  %s4421_s3 = inlined_call_operand.vmem [shape: bf16[64,128], index: 3, kind: input, shape index: {}]   ;;  %s4422_s4 = inlined_call_operand.vmem [shape: f32[5,128], index: 4, kind: input, shape index: {}]   ;;  %s4423_s5 = inlined_call_operand.hbm [shape: bf16[512,128], index: 5, kind: output, shape index: {}]  }
   0x1   :  { %12 = vsyncpa [#allocation3 + $0x1], 0  ;;  %s3207_s18 = smov 0   ;;  %s3209_s19 = smov 0  }
   0x2   :  { %s3211_s20 = smov 0   ;;  %s3213_s21 = smov 0  }
   0x3 LB: > { %s3228_s22 = sadd.s32 4294967295, %s3172_s21   ;;  %s2490_s23 = sadd.s32 4294967294, %s3172_s21   ;;  %s3172_s21 = sphi %s3213_s21, %s4429_s21   ;;  %s3168_s20 = sphi %s3211_s20, %s4428_s20   ;;  %s3164_s19 = sphi %s3209_s19, %s4427_s19   ;;  %s3160_s18 = sphi %s3207_s18, %s4426_s18  }
   0x4   : > { %s3232_s24 = sadd.s32 1, %s3172_s21   ;;  %s135_s25 = sadd.s32 1, %s3168_s20 }
   0x5   : > { %s132_s26 = ssub.s32 %s3172_s21, %s3232_s24  ;;  %p145_p0 = scmp.ne.s32.totalorder %s3168_s20, %s3164_s19 }
   0x6   : > { %p133_p1 = scmp.eq.s32.totalorder %s132_s26, 0  ;;  %p146_p2 = scmp.eq.s32.totalorder %s3228_s22, 1 }
   0x7   : > { %p151_p3 = scmp.ne.s32.totalorder %s3164_s19, %s3160_s18  ;;  %p152_p4 = scmp.eq.s32.totalorder %s2490_s23, 1 }
   0x8   : > { %s3243_s27 = scalar_select %p133_p1, %s3168_s20, %s135_s25  }
   0x9   : > { %p3245_p5 = por %p146_p2, %p145_p0  ;;  %p3249_p6 = por %p152_p4, %p151_p3 }
   0xa   : > { %p2493_p7 = scmp.ge.s32.totalorder %s3172_s21, 1  ;;  %p191_p8 = scmp.lt.s32.totalorder %s3172_s21, 3 }
   0xc   : > { %p192_p9 = pnand %p2493_p7, %p191_p8 }
   0xd   : > { %v2955_v0 = vld [vmem:[%s4419_s1] sm:$0xff] (!%p192_p9)   ;;  %s2495_s7 = sshll.u32 (!%p192_p9), %s3228_s22, 5  ;;  %v2956_v1 = vld [vmem:[%s4419_s1 + $0x8] sm:$0xff] (!%p192_p9)   ;;  %vm356_vm0 = vcmask (!%p192_p9), 261120   ;;  %vm566_vm1 = vcmask (!%p192_p9), 523264   ;;  %s216_s23 = sand.u32 (!%p192_p9), 1, %s3164_s19  }
   0xe   : > { %195 = sbr.rel (%p192_p9) target bundleno = 1192 (0x4a8), region = 40  ;;  %p220_p10 = scmp.lt.s32.totalorder (!%p192_p9), %s2495_s7, 63  ;;  %2794 = vmatprep.subr.bf16.mxu0 (!%p192_p9), %v2955_v0  ;;  %2910 = vmatprep.subr.bf16.mxu1 (!%p192_p9), %v2955_v0 }
   0xf   : > { %2795 = vmatpush3.bf16.msra.mxu0 (!%p192_p9), %v2955_v0  ;;  %2912 = vmatpush3.bf16.msra.mxu1 (!%p192_p9), %v2955_v0  ;;  %s2494_s25 = sshll.u32 (!%p192_p9), %s216_s23, 7  ;;  %s2640_s30 = sshll.u32 (!%p192_p9), %s3228_s22, 11 }
  0x10   : > { %2796 = vmatprep.subr.bf16.mxu0 (!%p192_p9), %v2956_v1  ;;  %2911 = vmatprep.subr.bf16.mxu1 (!%p192_p9), %v2956_v1  ;;  %s4320_s26 = scalar_lea.vmem (!%p192_p9), [#allocation2], %s2494_s25  ;;  %s4369_s9 = scalar_lea.hbm (!%p192_p9), %s4423_s5, %s2640_s30 }
  0x11   : > { %s2428_s6 = sshll.u32 (!%p192_p9), %s4320_s26, 4  ;;  %s4377_s22 = scalar_lea.sflag (!%p192_p9), [#allocation3], %s216_s23  ;;  %s4371_s6 = int_to_ptr.vmem [resolvable:$true] %s2428_s6 }
  0x12   : > { %s3174_s11 = smov (!%p192_p9), [#allocation2]  }
  0x13   : > { %2797 = vmatpush3.bf16.msra.mxu0 (!%p192_p9), %v2956_v1  ;;  %2913 = vmatpush3.bf16.msra.mxu1 (!%p192_p9), %v2956_v1  ;;  %s3114_s12 = sshll.u32 (!%p192_p9), %s3174_s11, 4  ;;  %s3115_s12 = int_to_ptr.vmem [resolvable:$false] %s3114_s12 }
  0x14   : > { %p3117_p0 = scmp.lt.s32.totalorder (!%p192_p9), %s4371_s6, %s3115_s12 }
  0x15   : > { %s4431_s7 = smov (!%p220_p10, %s2495_s7), 63 }
  0x16   : > { %s2496_s10 = sshll.u32 %s4431_s7, 2 }
  0x17   : > { %s3265_s13 = scalar_lea.vmem %s4418_s0, %s2496_s10  ;;  %s3110_s10 = scalar_lea.vmem %s4371_s6, 2048 }
  0x18   : > { %v2957_v2 = vld [vmem:[%s3265_s13] sm:$0xff]   ;;  %v2959_v4 = vld [vmem:[%s3265_s13 + $0x8] sm:$0xff]   ;;  %v2961_v6 = vld [vmem:[%s3265_s13 + $0x10] sm:$0xff]   ;;  %p3111_p11 = scmp.ne.s32.totalorder %s4371_s6, %s3110_s10 }
  0x19   : > { %v2958_v3 = vld [vmem:[%s3265_s13 + $0x40] sm:$0xff]   ;;  %2798 = vmatprep.mubr.msk.bf16.mxu0 %vm356_vm0, %v2957_v2  ;;  %v2960_v5 = vld [vmem:[%s3265_s13 + $0x48] sm:$0xff]   ;;  %v2963_v7 = vld [vmem:[%s3265_s13 + $0x50] sm:$0xff]  }
  0x1a   : > { %2814 = vmatprep.mubr.msk.bf16.mxu1 %vm356_vm0, %v2958_v3  ;;  %2799 = vmatmul.mubr.msk.bf16.vlgmr.msra.gmra.mrb[0].mxu0 %vm356_vm0, %v2959_v4  ;;  %v2962_v8 = vld [vmem:[%s3265_s13 + $0x18] sm:$0xff]   ;;  %v2965_v10 = vld [vmem:[%s3265_s13 + $0x20] sm:$0xff]   ;;  %v2966_v12 = vld [vmem:[%s3265_s13 + $0x28] sm:$0xff]   ;;  %p3112_p12 = pnand %p3111_p11, %p3245_p5 }
  0x1b   : > { %2815 = vmatmul.mubr.msk.bf16.vlgmr.msra.gmra.mrb[0].mxu1 %vm356_vm0, %v2960_v5  ;;  %2802 = vmatprep.mubr.msk.bf16.mxu0 %vm356_vm0, %v2961_v6  ;;  %v2964_v9 = vld [vmem:[%s3265_s13 + $0x58] sm:$0xff]   ;;  %v2969_v11 = vld [vmem:[%s3265_s13 + $0x60] sm:$0xff]   ;;  %v2967_v13 = vld [vmem:[%s3265_s13 + $0x30] sm:$0xff]  }
  0x1c   : > { %2818 = vmatprep.mubr.msk.bf16.mxu1 %vm356_vm0, %v2963_v7  ;;  %v2970_v14 = vld [vmem:[%s3265_s13 + $0x68] sm:$0xff]   ;;  %v2971_v15 = vld [vmem:[%s3265_s13 + $0x70] sm:$0xff]   ;;  %v2968_v16 = vld [vmem:[%s3265_s13 + $0x38] sm:$0xff]   ;;  %p3113_p13 = pneg %p3112_p12 }
  0x1d   : > { %v2972_v17 = vld [vmem:[%s3265_s13 + $0x78] sm:$0xff]   ;;  %s3116_s13 = scalar_lea.vmem %s3115_s12, 4096 }
  0x1e   : > { %p3118_p1 = scmp.lt.s32.totalorder %s3116_s13, %s3110_s10 }
  0x20   : > { %p3119_p2 = por %p3118_p1, %p3117_p0 }
  0x22   : > { %2803 = vmatmul.mubr.msk.bf16.gmra.mrb[4].mxu0 %vm356_vm0, %v2962_v8  ;;  %p3120_p3 = pnand %p3119_p2, %p3113_p13 }
  0x23   : > { %2819 = vmatmul.mubr.msk.bf16.gmra.mrb[4].mxu1 %vm356_vm0, %v2964_v9  ;;  %2806 = vmatprep.mubr.msk.bf16.mxu0 %vm356_vm0, %v2965_v10 }
  0x24   : > { %2822 = vmatprep.mubr.msk.bf16.mxu1 %vm356_vm0, %v2969_v11 }
  0x2a   : > { %2807 = vmatmul.mubr.msk.bf16.gmra.mrb[8].mxu0 %vm356_vm0, %v2966_v12 }
  0x2b   : > { %2810 = vmatprep.mubr.msk.bf16.mxu0 %vm356_vm0, %v2967_v13  ;;  %2823 = vmatmul.mubr.msk.bf16.gmra.mrb[8].mxu1 %vm356_vm0, %v2970_v14 }
  0x2c   : > { %2826 = vmatprep.mubr.msk.bf16.mxu1 %vm356_vm0, %v2971_v15 }
  0x32   : > { %2811 = vmatmul.mubr.msk.bf16.gmra.mrb[12].mxu0 %vm356_vm0, %v2968_v16 }
  0x33   : > { %2827 = vmatmul.mubr.msk.bf16.gmra.mrb[12].mxu1 %vm356_vm0, %v2972_v17 }
  0xed   : > { %v3299_v18 = vpop.f32.mrb[0].mxu0 }
  0xee   : > { %v3301_v19 = vpop.f32.mrb[0].mxu1  ;;  %v3303_v20 = vpop.f32.mrb[1].mxu0  ;;  %v573_v21 = vsel %vm566_vm1, %v3299_v18, 0.0  ;;  %v698_v35 = vmul.f32 %v3299_v18, %v3299_v18 }
  0xef   : > { %v3307_v22 = vpop.f32.mrb[1].mxu1  ;;  %v621_v23 = vsel %vm566_vm1, %v3301_v19, 0.0  ;;  %574 = vadd.xlane.f32.xlu1 %v573_v21  ;;  %v3311_v24 = vpop.f32.mrb[2].mxu0  ;;  %v567_v29 = vsel %vm566_vm1, %v3303_v20, 0.0  ;;  %v714_v44 = vmul.f32 %v3301_v19, %v3301_v19  ;;  %v696_v59 = vmul.f32 %v3303_v20, %v3303_v20 }
  0xf0   : > { %622 = vadd.xlane.f32.xlu0 %v621_v23  ;;  %v3313_v25 = vpop.f32.mrb[2].mxu1  ;;  %v3315_v26 = vpop.f32.mrb[3].mxu0  ;;  %v576_v28 = vsel %vm566_vm1, %v3311_v24, 0.0  ;;  %v615_v34 = vsel %vm566_vm1, %v3307_v22, 0.0  ;;  %v699_v42 = vmul.f32 %v3311_v24, %v3311_v24  ;;  %v734_v43 = vsel %vm566_vm1, %v698_v35, 0.0 }
  0xf1   : > { %v3317_v27 = vpop.f32.mrb[3].mxu1  ;;  %v624_v31 = vsel %vm566_vm1, %v3313_v25, 0.0  ;;  %v715_v47 = vmul.f32 %v3313_v25, %v3313_v25  ;;  %v782_v50 = vsel %vm566_vm1, %v714_v44, 0.0  ;;  %v697_v57 = vmul.f32 %v3315_v26, %v3315_v26 }
  0xf2   : > { %v618_v41 = vsel %vm566_vm1, %v3317_v27, 0.0  ;;  %v737_v46 = vsel %vm566_vm1, %v699_v42, 0.0  ;;  %v570_v58 = vsel %vm566_vm1, %v3315_v26, 0.0  ;;  %v713_v62 = vmul.f32 %v3317_v27, %v3317_v27  ;;  %v2973_v42 = vld [vmem:[%s4420_s2] sm:$0xff]  }
  0xf3   : > { %577 = vadd.xlane.f32.xlu1 %v576_v28  ;;  %v785_v56 = vsel %vm566_vm1, %v715_v47, 0.0  ;;  %v731_v61 = vsel %vm566_vm1, %v697_v57, 0.0  ;;  %v728_v1 = vsel %vm566_vm1, %v696_v59, 0.0  ;;  %v712_v2 = vmul.f32 %v3307_v22, %v3307_v22  ;;  %2830 = vmatprep.subr.bf16.mxu1 %v2973_v42 }
  0xf4   : > { %568 = vadd.xlane.f32.xlu0 %v567_v29  ;;  %v779_v8 = vsel %vm566_vm1, %v713_v62, 0.0  ;;  %2831 = vmatpush3.bf16.msra.mxu1 %v2973_v42 }
  0xf5   : > { %v3323_v30 = vpop.f32.mrb[4].mxu0  ;;  %v776_v9 = vsel %vm566_vm1, %v712_v2, 0.0  ;;  %v2976_v2 = vld [vmem:[%s4420_s2 + $0x18] sm:$0xff]  }
  0xf6   : > { %v3327_v32 = vpop.f32.mrb[5].mxu0  ;;  %v3329_v33 = vpop.f32.mrb[4].mxu1  ;;  %v585_v11 = vsel %vm566_vm1, %v3323_v30, 0.0  ;;  %v702_v23 = vmul.f32 %v3323_v30, %v3323_v30 }
  0xf7   : > { %625 = vadd.xlane.f32.xlu1 %v624_v31  ;;  %v3335_v36 = vpop.f32.mrb[6].mxu0  ;;  %v3337_v37 = vpop.f32.mrb[5].mxu1  ;;  %v633_v13 = vsel %vm566_vm1, %v3329_v33, 0.0  ;;  %v579_v15 = vsel %vm566_vm1, %v3327_v32, 0.0 }
  0xf8   : > { %616 = vadd.xlane.f32.xlu0 %v615_v34  ;;  %v3339_v38 = vpop.f32.mrb[7].mxu0  ;;  %v3341_v39 = vpop.f32.mrb[6].mxu1  ;;  %v588_v10 = vsel %vm566_vm1, %v3335_v36, 0.0  ;;  %v703_v17 = vmul.f32 %v3335_v36, %v3335_v36  ;;  %v627_v21 = vsel %vm566_vm1, %v3337_v37, 0.0  ;;  %v746_v31 = vsel %vm566_vm1, %v702_v23, 0.0 }
  0xf9   : > { %v3343_v40 = vpop.f32.mrb[7].mxu1  ;;  %v636_v12 = vsel %vm566_vm1, %v3341_v39, 0.0  ;;  %v582_v14 = vsel %vm566_vm1, %v3339_v38, 0.0  ;;  %v701_v29 = vmul.f32 %v3339_v38, %v3339_v38  ;;  %v700_v34 = vmul.f32 %v3327_v32, %v3327_v32 }
  0xfa   : > { %v630_v16 = vsel %vm566_vm1, %v3343_v40, 0.0  ;;  %v749_v28 = vsel %vm566_vm1, %v703_v17, 0.0  ;;  %v716_v44 = vmul.f32 %v3337_v37, %v3337_v37 }
  0xfb   : > { %619 = vadd.xlane.f32.xlu1 %v618_v41  ;;  %v743_v35 = vsel %vm566_vm1, %v701_v29, 0.0  ;;  %v717_v41 = vmul.f32 %v3343_v40, %v3343_v40 }
  0xfc   : > { %735 = vadd.xlane.f32.xlu0 %v734_v43  ;;  %v740_v43 = vsel %vm566_vm1, %v700_v34, 0.0  ;;  %v788_v47 = vsel %vm566_vm1, %v716_v44, 0.0 }
  0xfd   : > { %v3352_v45 = vpop.f32.mrb[8].mxu0 }
  0xfe   : > { %v3357_v48 = vpop.f32.mrb[9].mxu0  ;;  %v3359_v49 = vpop.f32.mrb[8].mxu1  ;;  %v597_v57 = vsel %vm566_vm1, %v3352_v45, 0.0 }
  0xff   : > { %738 = vadd.xlane.f32.xlu1 %v737_v46  ;;  %v3362_v51 = vpop.f32.mrb[10].mxu0  ;;  %v3364_v52 = vpop.f32.mrb[9].mxu1  ;;  %v791_v46 = vsel %vm566_vm1, %v717_v41, 0.0  ;;  %v591_v62 = vsel %vm566_vm1, %v3357_v48, 0.0  ;;  %v719_v41 = vmul.f32 %v3341_v39, %v3341_v39 }
 0x100   : > { %783 = vadd.xlane.f32.xlu0 %v782_v50  ;;  %v3366_v53 = vpop.f32.mrb[11].mxu0  ;;  %v3368_v54 = vpop.f32.mrb[10].mxu1  ;;  %v2974_v50 = vld [vmem:[%s4420_s2 + $0x8] sm:$0xff]  }
 0x101   : > { %v3370_v55 = vpop.f32.mrb[11].mxu1  ;;  %2832 = vmatprep.subr.bf16.mxu1 %v2974_v50  ;;  %v594_v59 = vsel %vm566_vm1, %v3366_v53, 0.0  ;;  %v797_v44 = vsel %vm566_vm1, %v719_v41, 0.0 }
 0x102   : > { %2833 = vmatpush3.bf16.msra.mxu1 %v2974_v50  ;;  %v639_v50 = vsel %vm566_vm1, %v3364_v52, 0.0 }
 0x103   : > { %786 = vadd.xlane.f32.xlu1 %v785_v56  ;;  %v600_v56 = vsel %vm566_vm1, %v3362_v51, 0.0 }
 0x104   : > { %571 = vadd.xlane.f32.xlu0 %v570_v58  ;;  %v2975_v58 = vld [vmem:[%s4420_s2 + $0x10] sm:$0xff]  }
 0x105   : > { %v3379_v60 = vpop.f32.mrb[12].mxu0  ;;  %2834 = vmatprep.subr.bf16.mxu1 %v2975_v58 }
 0x106   : > { %v3384_v63 = vpop.f32.mrb[13].mxu0  ;;  %v3386_v0 = vpop.f32.mrb[12].mxu1  ;;  %2835 = vmatpush3.bf16.msra.mxu1 %v2975_v58  ;;  %v710_v23 = vmul.f32 %v3379_v60, %v3379_v60  ;;  %v645_v58 = vsel %vm566_vm1, %v3359_v49, 0.0 }
 0x107   : > { %732 = vadd.xlane.f32.xlu1 %v731_v61  ;;  %v3391_v3 = vpop.f32.mrb[14].mxu0  ;;  %v3393_v4 = vpop.f32.mrb[13].mxu1  ;;  %v707_v61 = vmul.f32 %v3362_v51, %v3362_v51  ;;  %2836 = vmatprep.subr.bf16.mxu1 %v2976_v2  ;;  %v708_v34 = vmul.f32 %v3384_v63, %v3384_v63 }
 0x108   : > { %729 = vadd.xlane.f32.xlu0 %v728_v1  ;;  %v3395_v5 = vpop.f32.mrb[15].mxu0  ;;  %v3397_v6 = vpop.f32.mrb[14].mxu1  ;;  %v706_v1 = vmul.f32 %v3352_v45, %v3352_v45  ;;  %v711_v17 = vmul.f32 %v3391_v3, %v3391_v3 }
 0x109   : > { %v3399_v7 = vpop.f32.mrb[15].mxu1  ;;  %v709_v29 = vmul.f32 %v3395_v5, %v3395_v5  ;;  %v764_v42 = vsel %vm566_vm1, %v708_v34, 0.0 }
 0x10a   : > { %2837 = vmatpush3.bf16.msra.mxu1 %v2976_v2  ;;  %v722_v2 = vmul.f32 %v3359_v49, %v3359_v49 }
 0x10b   : > { %780 = vadd.xlane.f32.xlu1 %v779_v8  ;;  %v761_v8 = vsel %vm566_vm1, %v707_v61, 0.0 }
 0x10c   : > { %777 = vadd.xlane.f32.xlu0 %v776_v9  ;;  %v705_v9 = vmul.f32 %v3366_v53, %v3366_v53 }
 0x10f   : > { %589 = vadd.xlane.f32.xlu1 %v588_v10  ;;  %v758_v10 = vsel %vm566_vm1, %v706_v1, 0.0 }
 0x110   : > { %586 = vadd.xlane.f32.xlu0 %v585_v11  ;;  %v704_v11 = vmul.f32 %v3357_v48, %v3357_v48 }
 0x113   : > { %637 = vadd.xlane.f32.xlu1 %v636_v12  ;;  %v755_v12 = vsel %vm566_vm1, %v705_v9, 0.0  ;;  %v806_v9 = vsel %vm566_vm1, %v722_v2, 0.0 }
 0x114   : > { %634 = vadd.xlane.f32.xlu0 %v633_v13  ;;  %v752_v13 = vsel %vm566_vm1, %v704_v11, 0.0  ;;  %v651_v11 = vsel %vm566_vm1, %v3393_v4, 0.0 }
 0x117   : > { %583 = vadd.xlane.f32.xlu1 %v582_v14  ;;  %v612_v14 = vsel %vm566_vm1, %v3391_v3, 0.0 }
 0x118   : > { %580 = vadd.xlane.f32.xlu0 %v579_v15  ;;  %v609_v15 = vsel %vm566_vm1, %v3379_v60, 0.0 }
 0x11b   : > { %631 = vadd.xlane.f32.xlu1 %v630_v16  ;;  %v606_v16 = vsel %vm566_vm1, %v3395_v5, 0.0 }
 0x11c   : > { %628 = vadd.xlane.f32.xlu0 %v627_v21  ;;  %v603_v21 = vsel %vm566_vm1, %v3384_v63, 0.0 }
 0x11f   : > { %750 = vadd.xlane.f32.xlu1 %v749_v28  ;;  %v773_v28 = vsel %vm566_vm1, %v711_v17, 0.0  ;;  %v727_v17 = vmul.f32 %v3397_v6, %v3397_v6 }
 0x120   : > { %747 = vadd.xlane.f32.xlu0 %v746_v31  ;;  %v770_v31 = vsel %vm566_vm1, %v710_v23, 0.0  ;;  %v726_v23 = vmul.f32 %v3386_v0, %v3386_v0 }
 0x123   : > { %744 = vadd.xlane.f32.xlu1 %v743_v35  ;;  %v767_v35 = vsel %vm566_vm1, %v709_v29, 0.0  ;;  %v818_v29 = vsel %vm566_vm1, %v726_v23, 0.0 }
 0x124   : > { %741 = vadd.xlane.f32.xlu0 %v740_v43  ;;  %v718_v43 = vmul.f32 %v3329_v33, %v3329_v33 }
 0x127   : > { %792 = vadd.xlane.f32.xlu1 %v791_v46  ;;  %v794_v46 = vsel %vm566_vm1, %v718_v43, 0.0 }
 0x128   : > { %789 = vadd.xlane.f32.xlu0 %v788_v47  ;;  %v642_v47 = vsel %vm566_vm1, %v3370_v55, 0.0 }
 0x12b   : > { %601 = vadd.xlane.f32.xlu1 %v600_v56  ;;  %v648_v56 = vsel %vm566_vm1, %v3368_v54, 0.0 }
 0x12c   : > { %598 = vadd.xlane.f32.xlu0 %v597_v57  ;;  %v721_v57 = vmul.f32 %v3370_v55, %v3370_v55 }
 0x12e   : > { %v803_v61 = vsel %vm566_vm1, %v721_v57, 0.0 }
 0x12f   : > { %595 = vadd.xlane.f32.xlu1 %v594_v59  ;;  %v720_v59 = vmul.f32 %v3364_v52, %v3364_v52 }
 0x130   : > { %592 = vadd.xlane.f32.xlu0 %v591_v62  ;;  %v723_v62 = vmul.f32 %v3368_v54, %v3368_v54 }
 0x131   : > { %v800_v1 = vsel %vm566_vm1, %v720_v59, 0.0  ;;  %v1048_v59 = vlaneseq }
 0x133   : > { %762 = vadd.xlane.f32.xlu1 %v761_v8  ;;  %v809_v8 = vsel %vm566_vm1, %v723_v62, 0.0 }
 0x134   : > { %759 = vadd.xlane.f32.xlu0 %v758_v10  ;;  %v654_v10 = vsel %vm566_vm1, %v3399_v7, 0.0 }
 0x137   : > { %756 = vadd.xlane.f32.xlu1 %v755_v12  ;;  %v660_v12 = vsel %vm566_vm1, %v3397_v6, 0.0 }
 0x138   : > { %753 = vadd.xlane.f32.xlu0 %v752_v13  ;;  %v725_v13 = vmul.f32 %v3399_v7, %v3399_v7 }
 0x13b   : > { %613 = vadd.xlane.f32.xlu1 %v612_v14  ;;  %v657_v14 = vsel %vm566_vm1, %v3386_v0, 0.0 }
 0x13c   : > { %610 = vadd.xlane.f32.xlu0 %v609_v15  ;;  %v724_v15 = vmul.f32 %v3393_v4, %v3393_v4 }
 0x13f   : > { %607 = vadd.xlane.f32.xlu1 %v606_v16  ;;  %v815_v16 = vsel %vm566_vm1, %v725_v13, 0.0 }
 0x140   : > { %604 = vadd.xlane.f32.xlu0 %v603_v21  ;;  %v812_v21 = vsel %vm566_vm1, %v724_v15, 0.0 }
 0x143   : > { %774 = vadd.xlane.f32.xlu1 %v773_v28  ;;  %v821_v28 = vsel %vm566_vm1, %v727_v17, 0.0 }
 0x144   : > { %771 = vadd.xlane.f32.xlu0 %v770_v31 }
 0x147   : > { %768 = vadd.xlane.f32.xlu1 %v767_v35 }
 0x148   : > { %765 = vadd.xlane.f32.xlu0 %v764_v42 }
 0x14b   : > { %798 = vadd.xlane.f32.xlu1 %v797_v44 }
 0x14c   : > { %795 = vadd.xlane.f32.xlu0 %v794_v46 }
 0x14f   : > { %643 = vadd.xlane.f32.xlu1 %v642_v47 }
 0x150   : > { %640 = vadd.xlane.f32.xlu0 %v639_v50 }
 0x153   : > { %649 = vadd.xlane.f32.xlu1 %v648_v56 }
 0x154   : > { %646 = vadd.xlane.f32.xlu0 %v645_v58 }
 0x157   : > { %804 = vadd.xlane.f32.xlu1 %v803_v61 }
 0x158   : > { %801 = vadd.xlane.f32.xlu0 %v800_v1 }
 0x15b   : > { %810 = vadd.xlane.f32.xlu1 %v809_v8 }
 0x15c   : > { %807 = vadd.xlane.f32.xlu0 %v806_v9 }
 0x15f   : > { %655 = vadd.xlane.f32.xlu1 %v654_v10 }
 0x160   : > { %652 = vadd.xlane.f32.xlu0 %v651_v11 }
 0x163   : > { %661 = vadd.xlane.f32.xlu1 %v660_v12 }
 0x164   : > { %658 = vadd.xlane.f32.xlu0 %v657_v14  ;;  %v3545_v14 = vshrl.u32 %v1048_v59, 7 }
 0x167   : > { %816 = vadd.xlane.f32.xlu1 %v815_v16 }
 0x168   : > { %813 = vadd.xlane.f32.xlu0 %v812_v21 }
 0x16b   : > { %822 = vadd.xlane.f32.xlu1 %v821_v28 }
 0x16c   : > { %819 = vadd.xlane.f32.xlu0 %v818_v29 }
 0x17c   : > { %v575_v31 = vpop.xlane.xlu1 %574 }
 0x17d   : > { %v623_v34 = vpop.xlane.xlu0 %622  ;;  %v666_v44 = vmul.f32 0.015625, %v575_v31 }
 0x17e   : > { %v3537_v56 = vmul.f32 0.015625, %v623_v34 }
 0x17f   : > { %v858_v57 = vmul.f32 %v666_v44, %v666_v44 }
 0x180   : > { %v578_v35 = vpop.xlane.xlu1 %577  ;;  %v874_v10 = vmul.f32 %v3537_v56, %v3537_v56 }
 0x181   : > { %v569_v41 = vpop.xlane.xlu0 %568  ;;  %v3535_v47 = vmul.f32 0.015625, %v578_v35 }
 0x182   : > { %v3549_v29 = vmul.f32 0.015625, %v569_v41 }
 0x183   : > { %v859_v1 = vmul.f32 %v3535_v47, %v3535_v47 }
 0x184   : > { %v626_v42 = vpop.xlane.xlu1 %625 }
 0x185   : > { %v617_v43 = vpop.xlane.xlu0 %616  ;;  %v3541_v2 = vmul.f32 0.015625, %v626_v42  ;;  %v1050_v42 = vsub.s32 0, %v3545_v14 }
 0x187   : > { %v875_v17 = vmul.f32 %v3541_v2, %v3541_v2 }
 0x188   : > { %v620_v46 = vpop.xlane.xlu1 %619 }
 0x189   : > { %v736_v50 = vpop.xlane.xlu0 %735 }
 0x18a   : > { %v826_v58 = vmul.f32 0.015625, %v736_v50 }
 0x18c   : > { %v890_v61 = vsub.f32 %v826_v58, %v858_v57  ;;  %v739_v62 = vpop.xlane.xlu1 %738  ;;  %v227_v57 = vld [vmem:[%s4422_s4] sm:$0x1f]  ;;  %v3557_v58 = vmul.f32 0.015625, %v620_v46 }
 0x18d   : > { %v784_v8 = vpop.xlane.xlu0 %783  ;;  %v827_v9 = vmul.f32 0.015625, %v739_v62 }
 0x18e   : > { %v954_v11 = vadd.f32 1e-05, %v890_v61  ;;  %v842_v12 = vmul.f32 0.015625, %v784_v8  ;;  %v3563_v8 = vmul.f32 0.015625, %v617_v43 }
 0x18f   : > { %v891_v13 = vsub.f32 %v827_v9, %v859_v1  ;;  %v856_v1 = vmul.f32 %v3549_v29, %v3549_v29 }
 0x190   : > { %2981 = vrsqrt.f32 %v954_v11  ;;  %v906_v15 = vsub.f32 %v842_v12, %v874_v10  ;;  %v787_v16 = vpop.xlane.xlu1 %786  ;;  %v3565_v11 = vrot.slane %v227_v57, %v1050_v42  ;;  %v1086_v12 = vsub.s32 1, %v3545_v14 }
 0x191   : > { %v955_v21 = vadd.f32 1e-05, %v891_v13  ;;  %v843_v23 = vmul.f32 0.015625, %v787_v16  ;;  %v572_v28 = vpop.xlane.xlu0 %571  ;;  %v873_v16 = vmul.f32 %v3557_v58, %v3557_v58  ;;  %v872_v43 = vmul.f32 %v3563_v8, %v3563_v8 }
 0x192   : > { %v970_v31 = vadd.f32 1e-05, %v906_v15  ;;  %v3551_v34 = vmul.f32 0.015625, %v572_v28  ;;  %v922_v15 = vsub.f32 %v3299_v18, %v666_v44 }
 0x193   : > { %2983 = vrsqrt.f32 %v955_v21  ;;  %v907_v35 = vsub.f32 %v843_v23, %v875_v17 }
 0x194   : > { %2985 = vrsqrt.f32 %v970_v31  ;;  %v733_v50 = vpop.xlane.xlu1 %732  ;;  %v857_v41 = vmul.f32 %v3551_v34, %v3551_v34 }
 0x195   : > { %v971_v59 = vadd.f32 1e-05, %v907_v35  ;;  %v825_v61 = vmul.f32 0.015625, %v733_v50  ;;  %v730_v62 = vpop.xlane.xlu0 %729 }
 0x196   : > { %v824_v9 = vmul.f32 0.015625, %v730_v62 }
 0x197   : > { %2987 = vrsqrt.f32 %v971_v59  ;;  %v889_v10 = vsub.f32 %v825_v61, %v857_v41  ;;  %v923_v59 = vsub.f32 %v3311_v24, %v3535_v47  ;;  %v3575_v41 = vrot.slane %v227_v57, %v1086_v12 }
 0x198   : > { %v888_v46 = vsub.f32 %v824_v9, %v856_v1  ;;  %v781_v13 = vpop.xlane.xlu1 %780  ;;  %v939_v24 = vsub.f32 %v3313_v25, %v3541_v2 }
 0x199   : > { %v953_v17 = vadd.f32 1e-05, %v889_v10  ;;  %v841_v21 = vmul.f32 0.015625, %v781_v13  ;;  %v778_v23 = vpop.xlane.xlu0 %777 }
 0x19a   : > { %v2982_v28 = vpop.eup %2981  ;;  %v952_v31 = vadd.f32 1e-05, %v888_v46  ;;  %v840_v35 = vmul.f32 0.015625, %v778_v23 }
 0x19b   : > { %v1018_v42 = vmul.f32 %v2982_v28, %v922_v15  ;;  %2989 = vrsqrt.f32 %v953_v17  ;;  %v905_v50 = vsub.f32 %v841_v21, %v873_v16  ;;  %v938_v15 = vsub.f32 %v3301_v19, %v3537_v56 }
 0x19c   : > { %2991 = vrsqrt.f32 %v952_v31  ;;  %v904_v18 = vsub.f32 %v840_v35, %v872_v43  ;;  %v590_v44 = vpop.xlane.xlu1 %589  ;;  %v921_v56 = vsub.f32 %v3315_v26, %v3551_v34  ;;  %v937_v26 = vsub.f32 %v3317_v27, %v3557_v58 }
 0x19d   : > { %v2984_v61 = vpop.eup %2983  ;;  %v1054_v62 = vmul.f32 %v3565_v11, %v1018_v42  ;;  %v969_v1 = vadd.f32 1e-05, %v905_v50  ;;  %v587_v9 = vpop.xlane.xlu0 %586  ;;  %v920_v42 = vsub.f32 %v3303_v20, %v3549_v29  ;;  %v936_v20 = vsub.f32 %v3307_v22, %v3563_v8 }
 0x19e   : > { %v2986_v10 = vpop.eup %2985  ;;  %v1019_v13 = vmul.f32 %v2984_v61, %v923_v59  ;;  %v968_v46 = vadd.f32 1e-05, %v904_v18  ;;  %v3602_v29 = vmul.f32 0.015625, %v590_v44 }
 0x19f   : > { %2993 = vrsqrt.f32 %v969_v1  ;;  %v1090_v47 = vadd.f32 %v3575_v41, %v1054_v62  ;;  %v1034_v21 = vmul.f32 %v2986_v10, %v938_v15 }
 0x1a0   : > { %v1055_v57 = vmul.f32 %v3565_v11, %v1019_v13  ;;  %2995 = vrsqrt.f32 %v968_v46  ;;  %v3584_v12 = vpop.xlane.xlu1 %637  ;;  %v863_v44 = vmul.f32 %v3602_v29, %v3602_v29 }
 0x1a1   : > { %v2988_v16 = vpop.eup %2987  ;;  %v3586_v17 = vpop.xlane.xlu0 %634  ;;  %v1070_v19 = vmul.f32 %v3565_v11, %v1034_v21  ;;  %v1122_v2 = vmax.f32 %v1090_v47, 0.0  ;;  %v3605_v21 = vmul.f32 0.015625, %v587_v9 }
 0x1a2   : > { %v1091_v23 = vadd.f32 %v3575_v41, %v1055_v57  ;;  %v1035_v28 = vmul.f32 %v2988_v16, %v939_v24 }
 0x1a3   : > { %v1106_v59 = vadd.f32 %v3575_v41, %v1070_v19 }
 0x1a4   : > { %v584_v25 = vpop.xlane.xlu1 %583  ;;  %v1123_v43 = vmax.f32 %v1091_v23, 0.0  ;;  %v1071_v31 = vmul.f32 %v3565_v11, %v1035_v28 }
 0x1a5   : > { %v2990_v35 = vpop.eup %2989  ;;  %v581_v50 = vpop.xlane.xlu0 %580  ;;  %v1138_v46 = vmax.f32 %v1106_v59, 0.0 }
 0x1a6   : > { %v2992_v18 = vpop.eup %2991  ;;  %v1017_v61 = vmul.f32 %v2990_v35, %v921_v56  ;;  %v1153_v62 = vpack.c.bf16 %v1123_v43, %v1122_v2  ;;  %v1107_v1 = vadd.f32 %v3575_v41, %v1071_v31  ;;  %v3611_v56 = vmul.f32 0.015625, %v584_v25 }
 0x1a7   : > { %v1016_v10 = vmul.f32 %v2992_v18, %v920_v42  ;;  %v862_v42 = vmul.f32 %v3605_v21, %v3605_v21  ;;  %v3619_v59 = vmul.f32 0.015625, %v581_v50 }
 0x1a8   : > { %v632_v34 = vpop.xlane.xlu1 %631  ;;  %v1053_v13 = vmul.f32 %v3565_v11, %v1017_v61  ;;  %v1139_v15 = vmax.f32 %v1107_v1, 0.0 }
 0x1a9   : > { %v2994_v24 = vpop.eup %2993  ;;  %v629_v47 = vpop.xlane.xlu0 %628  ;;  %v1052_v57 = vmul.f32 %v3565_v11, %v1016_v10 }
 0x1aa   : > { %v2996_v16 = vpop.eup %2995  ;;  %v1089_v23 = vadd.f32 %v3575_v41, %v1053_v13  ;;  %v1033_v27 = vmul.f32 %v2994_v24, %v937_v26  ;;  %v3608_v58 = vpack.c.bf16 %v1139_v15, %v1138_v46  ;;  %v861_v26 = vmul.f32 %v3611_v56, %v3611_v56 }
 0x1ab   : > { %v1088_v28 = vadd.f32 %v3575_v41, %v1052_v57  ;;  %v1032_v19 = vmul.f32 %v2996_v16, %v936_v20  ;;  %v3625_v24 = vmul.f32 0.015625, %v632_v34 }
 0x1ac   : > { %v751_v2 = vpop.xlane.xlu1 %750  ;;  %v1121_v22 = vmax.f32 %v1089_v23, 0.0  ;;  %v1069_v8 = vmul.f32 %v3565_v11, %v1033_v27  ;;  %v860_v23 = vmul.f32 %v3619_v59, %v3619_v59  ;;  %v3630_v27 = vmul.f32 0.015625, %v629_v47 }
 0x1ad   : > { %v748_v43 = vpop.xlane.xlu0 %747  ;;  %v831_v9 = vmul.f32 0.015625, %v751_v2  ;;  %v1120_v31 = vmax.f32 %v1088_v28, 0.0  ;;  %v1068_v35 = vmul.f32 %v3565_v11, %v1032_v19 }
 0x1ae   : > { %v830_v18 = vmul.f32 0.015625, %v748_v43  ;;  %v1105_v25 = vadd.f32 %v3575_v41, %v1069_v8  ;;  %v876_v47 = vmul.f32 %v3630_v27, %v3630_v27 }
 0x1af   : > { %v895_v61 = vsub.f32 %v831_v9, %v863_v44  ;;  %v1152_v1 = vpack.c.bf16 %v1121_v22, %v1120_v31  ;;  %v1104_v10 = vadd.f32 %v3575_v41, %v1068_v35  ;;  %v877_v44 = vmul.f32 %v3625_v24, %v3625_v24 }
 0x1b0   : > { %v894_v13 = vsub.f32 %v830_v18, %v862_v42  ;;  %v745_v46 = vpop.xlane.xlu1 %744  ;;  %v1137_v15 = vmax.f32 %v1105_v25, 0.0 }
 0x1b1   : > { %v959_v20 = vadd.f32 1e-05, %v895_v61  ;;  %2838 = vmatprep.mubr.msk.bf16.mxu1 %vm566_vm1, %v1152_v1  ;;  %v742_v50 = vpop.xlane.xlu0 %741  ;;  %v829_v57 = vmul.f32 0.015625, %v745_v46  ;;  %v1136_v16 = vmax.f32 %v1104_v10, 0.0 }
 0x1b2   : > { %v958_v28 = vadd.f32 1e-05, %v894_v13  ;;  %v828_v19 = vmul.f32 0.015625, %v742_v50  ;;  %2839 = vmatmul.mubr.msk.bf16.vlgmr.msra.gmra.mrb[16].mxu1 %vm566_vm1, %v1153_v62 }
 0x1b3   : > { %2997 = vrsqrt.f32 %v959_v20  ;;  %v893_v2 = vsub.f32 %v829_v57, %v861_v26  ;;  %v3633_v22 = vpack.c.bf16 %v1137_v15, %v1136_v16  ;;  %v927_v26 = vsub.f32 %v3335_v36, %v3602_v29 }
 0x1b4   : > { %2999 = vrsqrt.f32 %v958_v28  ;;  %v892_v34 = vsub.f32 %v828_v19, %v860_v23  ;;  %v793_v8 = vpop.xlane.xlu1 %792  ;;  %v926_v15 = vsub.f32 %v3323_v30, %v3605_v21  ;;  %v925_v28 = vsub.f32 %v3339_v38, %v3611_v56 }
 0x1b5   : > { %v957_v43 = vadd.f32 1e-05, %v893_v2  ;;  %v790_v9 = vpop.xlane.xlu0 %789  ;;  %v845_v31 = vmul.f32 0.015625, %v793_v8  ;;  %v924_v36 = vsub.f32 %v3327_v32, %v3619_v59  ;;  %v941_v29 = vsub.f32 %v3343_v40, %v3625_v24 }
 0x1b6   : > { %v956_v35 = vadd.f32 1e-05, %v892_v34  ;;  %v844_v42 = vmul.f32 0.015625, %v790_v9 }
 0x1b7   : > { %3001 = vrsqrt.f32 %v957_v43  ;;  %v909_v62 = vsub.f32 %v845_v31, %v877_v44  ;;  %v940_v44 = vsub.f32 %v3337_v37, %v3630_v27 }
 0x1b8   : > { %3003 = vrsqrt.f32 %v956_v35  ;;  %v908_v18 = vsub.f32 %v844_v42, %v876_v47  ;;  %v602_v25 = vpop.xlane.xlu1 %601 }
 0x1b9   : > { %v973_v61 = vadd.f32 1e-05, %v909_v62  ;;  %v599_v1 = vpop.xlane.xlu0 %598  ;;  %v3643_v20 = vmul.f32 0.015625, %v602_v25 }
 0x1ba   : > { %v972_v10 = vadd.f32 1e-05, %v908_v18  ;;  %v3645_v16 = vmul.f32 0.015625, %v599_v1 }
 0x1bb   : > { %3005 = vrsqrt.f32 %v973_v61  ;;  %v867_v38 = vmul.f32 %v3643_v20, %v3643_v20 }
 0x1bc   : > { %3007 = vrsqrt.f32 %v972_v10  ;;  %v596_v13 = vpop.xlane.xlu1 %595  ;;  %v866_v40 = vmul.f32 %v3645_v16, %v3645_v16 }
 0x1bd   : > { %v2998_v46 = vpop.eup %2997  ;;  %v593_v50 = vpop.xlane.xlu0 %592  ;;  %v3649_v19 = vmul.f32 0.015625, %v596_v13 }
 0x1be   : > { %v3000_v57 = vpop.eup %2999  ;;  %v1023_v23 = vmul.f32 %v2998_v46, %v927_v26  ;;  %v3655_v30 = vmul.f32 0.015625, %v593_v50 }
 0x1bf   : > { %v1022_v2 = vmul.f32 %v3000_v57, %v926_v15  ;;  %v865_v47 = vmul.f32 %v3649_v19, %v3649_v19 }
 0x1c0   : > { %v763_v21 = vpop.xlane.xlu1 %762  ;;  %v1059_v34 = vmul.f32 %v3565_v11, %v1023_v23  ;;  %v864_v42 = vmul.f32 %v3655_v30, %v3655_v30 }
 0x1c1   : > { %v3002_v8 = vpop.eup %3001  ;;  %v760_v56 = vpop.xlane.xlu0 %759  ;;  %v835_v43 = vmul.f32 0.015625, %v763_v21  ;;  %v1058_v9 = vmul.f32 %v3565_v11, %v1022_v2 }
 0x1c2   : > { %v3004_v32 = vpop.eup %3003  ;;  %v834_v59 = vmul.f32 0.015625, %v760_v56  ;;  %v1021_v24 = vmul.f32 %v3002_v8, %v925_v28  ;;  %v1095_v31 = vadd.f32 %v3575_v41, %v1059_v34 }
 0x1c3   : > { %v899_v35 = vsub.f32 %v835_v43, %v867_v38  ;;  %v1020_v37 = vmul.f32 %v3004_v32, %v924_v36  ;;  %v1094_v27 = vadd.f32 %v3575_v41, %v1058_v9 }
 0x1c4   : > { %v898_v62 = vsub.f32 %v834_v59, %v866_v40  ;;  %v757_v18 = vpop.xlane.xlu1 %756  ;;  %v1057_v25 = vmul.f32 %v3565_v11, %v1021_v24  ;;  %v1127_v61 = vmax.f32 %v1095_v31, 0.0 }
 0x1c5   : > { %v3006_v1 = vpop.eup %3005  ;;  %v963_v10 = vadd.f32 1e-05, %v899_v35  ;;  %v754_v26 = vpop.xlane.xlu0 %753  ;;  %v833_v13 = vmul.f32 0.015625, %v757_v18  ;;  %v1056_v46 = vmul.f32 %v3565_v11, %v1020_v37  ;;  %v1126_v15 = vmax.f32 %v1094_v27, 0.0 }
 0x1c6   : > { %v3008_v50 = vpop.eup %3007  ;;  %v962_v57 = vadd.f32 1e-05, %v898_v62  ;;  %v832_v23 = vmul.f32 0.015625, %v754_v26  ;;  %v1093_v28 = vadd.f32 %v3575_v41, %v1057_v25  ;;  %v1037_v2 = vmul.f32 %v3006_v1, %v941_v29 }
 0x1c7   : > { %3009 = vrsqrt.f32 %v963_v10  ;;  %v897_v36 = vsub.f32 %v833_v13, %v865_v47  ;;  %v1092_v21 = vadd.f32 %v3575_v41, %v1056_v46  ;;  %v1155_v34 = vpack.c.bf16 %v1127_v61, %v1126_v15 }
 0x1c8   : > { %3011 = vrsqrt.f32 %v962_v57  ;;  %v896_v8 = vsub.f32 %v832_v23, %v864_v42  ;;  %v614_v38 = vpop.xlane.xlu1 %613  ;;  %v1125_v56 = vmax.f32 %v1093_v28, 0.0  ;;  %v1036_v43 = vmul.f32 %v3008_v50, %v940_v44 }
 0x1c9   : > { %v961_v9 = vadd.f32 1e-05, %v897_v36  ;;  %v611_v32 = vpop.xlane.xlu0 %610  ;;  %v1124_v40 = vmax.f32 %v1092_v21, 0.0  ;;  %v1073_v59 = vmul.f32 %v3565_v11, %v1037_v2  ;;  %v3678_v37 = vmul.f32 0.015625, %v614_v38 }
 0x1ca   : > { %v960_v24 = vadd.f32 1e-05, %v896_v8  ;;  %v1072_v31 = vmul.f32 %v3565_v11, %v1036_v43  ;;  %v3682_v42 = vmul.f32 0.015625, %v611_v32  ;;  %v3686_v18 = vmul.f32 0.015625, %v3584_v12 }
 0x1cb   : > { %3013 = vrsqrt.f32 %v961_v9  ;;  %v1154_v29 = vpack.c.bf16 %v1125_v56, %v1124_v40  ;;  %v1109_v44 = vadd.f32 %v3575_v41, %v1073_v59  ;;  %v930_v61 = vsub.f32 %v3352_v45, %v3645_v16 }
 0x1cc   : > { %3015 = vrsqrt.f32 %v960_v24  ;;  %v608_v47 = vpop.xlane.xlu1 %607  ;;  %v1108_v35 = vadd.f32 %v3575_v41, %v1072_v31  ;;  %v931_v1 = vsub.f32 %v3362_v51, %v3643_v20  ;;  %v871_v46 = vmul.f32 %v3678_v37, %v3678_v37 }
 0x1cd   : > { %2842 = vmatprep.mubr.msk.bf16.mxu1 %vm566_vm1, %v1154_v29  ;;  %v605_v27 = vpop.xlane.xlu0 %604  ;;  %v1141_v25 = vmax.f32 %v1109_v44, 0.0  ;;  %v3692_v10 = vmul.f32 0.015625, %v608_v47  ;;  %v3701_v28 = vmul.f32 0.015625, %v3586_v17  ;;  %v870_v45 = vmul.f32 %v3682_v42, %v3682_v42 }
 0x1ce   : > { %2843 = vmatmul.mubr.msk.bf16.gmra.mrb[20].mxu1 %vm566_vm1, %v1155_v34  ;;  %v1140_v62 = vmax.f32 %v1108_v35, 0.0  ;;  %v3696_v15 = vmul.f32 0.015625, %v605_v27  ;;  %v879_v16 = vmul.f32 %v3686_v18, %v3686_v18  ;;  %v929_v2 = vsub.f32 %v3366_v53, %v3649_v19 }
 0x1cf   : > { %v928_v34 = vsub.f32 %v3357_v48, %v3655_v30  ;;  %v869_v17 = vmul.f32 %v3692_v10, %v3692_v10 }
 0x1d0   : > { %v775_v26 = vpop.xlane.xlu1 %774  ;;  %v3698_v12 = vpack.c.bf16 %v1141_v25, %v1140_v62  ;;  %v868_v9 = vmul.f32 %v3696_v15, %v3696_v15 }
 0x1d1   : > { %v3010_v13 = vpop.eup %3009  ;;  %v772_v50 = vpop.xlane.xlu0 %771  ;;  %v839_v57 = vmul.f32 0.015625, %v775_v26 }
 0x1d2   : > { %v3012_v23 = vpop.eup %3011  ;;  %v838_v51 = vmul.f32 0.015625, %v772_v50  ;;  %v1027_v20 = vmul.f32 %v3010_v13, %v931_v1  ;;  %v878_v50 = vmul.f32 %v3701_v28, %v3701_v28 }
 0x1d3   : > { %v903_v36 = vsub.f32 %v839_v57, %v871_v46  ;;  %v1026_v21 = vmul.f32 %v3012_v23, %v930_v61 }
 0x1d4   : > { %v902_v8 = vsub.f32 %v838_v51, %v870_v45  ;;  %v769_v38 = vpop.xlane.xlu1 %768  ;;  %v1063_v56 = vmul.f32 %v3565_v11, %v1027_v20 }
 0x1d5   : > { %v3014_v43 = vpop.eup %3013  ;;  %v967_v32 = vadd.f32 1e-05, %v903_v36  ;;  %v766_v40 = vpop.xlane.xlu0 %765  ;;  %v837_v59 = vmul.f32 0.015625, %v769_v38  ;;  %v1062_v53 = vmul.f32 %v3565_v11, %v1026_v21 }
 0x1d6   : > { %v3016_v19 = vpop.eup %3015  ;;  %v966_v24 = vadd.f32 1e-05, %v902_v8  ;;  %v836_v31 = vmul.f32 0.015625, %v766_v40  ;;  %v1025_v48 = vmul.f32 %v3014_v43, %v929_v2  ;;  %v1099_v30 = vadd.f32 %v3575_v41, %v1063_v56 }
 0x1d7   : > { %3017 = vrsqrt.f32 %v967_v32  ;;  %v901_v29 = vsub.f32 %v837_v59, %v869_v17  ;;  %v1024_v47 = vmul.f32 %v3016_v19, %v928_v34  ;;  %v1098_v35 = vadd.f32 %v3575_v41, %v1062_v53 }
 0x1d8   : > { %3019 = vrsqrt.f32 %v966_v24  ;;  %v900_v27 = vsub.f32 %v836_v31, %v868_v9  ;;  %v799_v44 = vpop.xlane.xlu1 %798  ;;  %v1061_v62 = vmul.f32 %v3565_v11, %v1025_v48  ;;  %v1131_v25 = vmax.f32 %v1099_v30, 0.0 }
 0x1d9   : > { %v965_v61 = vadd.f32 1e-05, %v901_v29  ;;  %v796_v1 = vpop.xlane.xlu0 %795  ;;  %v847_v26 = vmul.f32 0.015625, %v799_v44  ;;  %v1060_v13 = vmul.f32 %v3565_v11, %v1024_v47  ;;  %v1130_v46 = vmax.f32 %v1098_v35, 0.0 }
 0x1da   : > { %v964_v57 = vadd.f32 1e-05, %v900_v27  ;;  %v846_v23 = vmul.f32 0.015625, %v796_v1  ;;  %v1097_v45 = vadd.f32 %v3575_v41, %v1061_v62  ;;  %v935_v9 = vsub.f32 %v3391_v3, %v3678_v37 }
 0x1db   : > { %3021 = vrsqrt.f32 %v965_v61  ;;  %v911_v51 = vsub.f32 %v847_v26, %v879_v16  ;;  %v1096_v20 = vadd.f32 %v3575_v41, %v1060_v13  ;;  %v1157_v2 = vpack.c.bf16 %v1131_v25, %v1130_v46 }
 0x1dc   : > { %3023 = vrsqrt.f32 %v964_v57  ;;  %v910_v36 = vsub.f32 %v846_v23, %v878_v50  ;;  %v644_v21 = vpop.xlane.xlu1 %643  ;;  %v1129_v34 = vmax.f32 %v1097_v45, 0.0  ;;  %v934_v16 = vsub.f32 %v3379_v60, %v3682_v42 }
 0x1dd   : > { %v975_v17 = vadd.f32 1e-05, %v911_v51  ;;  %v641_v8 = vpop.xlane.xlu0 %640  ;;  %v1128_v38 = vmax.f32 %v1096_v20, 0.0  ;;  %v3729_v59 = vmul.f32 0.015625, %v644_v21  ;;  %v943_v3 = vsub.f32 %v3341_v39, %v3686_v18 }
 0x1de   : > { %v974_v56 = vadd.f32 1e-05, %v910_v36  ;;  %v3732_v24 = vmul.f32 0.015625, %v641_v8  ;;  %v942_v60 = vsub.f32 %v3329_v33, %v3701_v28  ;;  %v933_v42 = vsub.f32 %v3395_v5, %v3692_v10 }
 0x1df   : > { %3025 = vrsqrt.f32 %v975_v17  ;;  %v1156_v43 = vpack.c.bf16 %v1129_v34, %v1128_v38  ;;  %v881_v37 = vmul.f32 %v3729_v59, %v3729_v59  ;;  %v932_v39 = vsub.f32 %v3384_v63, %v3696_v15 }
 0x1e0   : > { %3027 = vrsqrt.f32 %v974_v56  ;;  %v650_v32 = vpop.xlane.xlu1 %649  ;;  %v880_v30 = vmul.f32 %v3732_v24, %v3732_v24 }
 0x1e1   : > { %v3018_v40 = vpop.eup %3017  ;;  %2846 = vmatprep.mubr.msk.bf16.mxu1 %vm566_vm1, %v1156_v43  ;;  %v647_v53 = vpop.xlane.xlu0 %646  ;;  %v3748_v18 = vmul.f32 0.015625, %v650_v32 }
 0x1e2   : > { %v3020_v19 = vpop.eup %3019  ;;  %2847 = vmatmul.mubr.msk.bf16.gmra.mrb[24].mxu1 %vm566_vm1, %v1157_v2  ;;  %v1031_v31 = vmul.f32 %v3018_v40, %v935_v9  ;;  %v3751_v28 = vmul.f32 0.015625, %v647_v53 }
 0x1e3   : > { %v1030_v48 = vmul.f32 %v3020_v19, %v934_v16  ;;  %v883_v61 = vmul.f32 %v3748_v18, %v3748_v18 }
 0x1e4   : > { %v805_v29 = vpop.xlane.xlu1 %804  ;;  %v1067_v47 = vmul.f32 %v3565_v11, %v1031_v31  ;;  %v882_v15 = vmul.f32 %v3751_v28, %v3751_v28 }
 0x1e5   : > { %v3022_v35 = vpop.eup %3021  ;;  %v802_v27 = vpop.xlane.xlu0 %801  ;;  %v849_v44 = vmul.f32 0.015625, %v805_v29  ;;  %v1066_v62 = vmul.f32 %v3565_v11, %v1030_v48 }
 0x1e6   : > { %v3024_v33 = vpop.eup %3023  ;;  %v848_v5 = vmul.f32 0.015625, %v802_v27  ;;  %v1029_v10 = vmul.f32 %v3022_v35, %v933_v42  ;;  %v1103_v25 = vadd.f32 %v3575_v41, %v1067_v47 }
 0x1e7   : > { %v913_v1 = vsub.f32 %v849_v44, %v881_v37  ;;  %v1028_v26 = vmul.f32 %v3024_v33, %v932_v39  ;;  %v1102_v63 = vadd.f32 %v3575_v41, %v1066_v62 }
 0x1e8   : > { %v912_v13 = vsub.f32 %v848_v5, %v880_v30  ;;  %v811_v46 = vpop.xlane.xlu1 %810  ;;  %v1065_v50 = vmul.f32 %v3565_v11, %v1029_v10  ;;  %v1135_v57 = vmax.f32 %v1103_v25, 0.0  ;;  %v945_v5 = vsub.f32 %v3370_v55, %v3729_v59 }
 0x1e9   : > { %v3026_v23 = vpop.eup %3025  ;;  %v977_v45 = vadd.f32 1e-05, %v913_v1  ;;  %v808_v51 = vpop.xlane.xlu0 %807  ;;  %v851_v20 = vmul.f32 0.015625, %v811_v46  ;;  %v1064_v2 = vmul.f32 %v3565_v11, %v1028_v26  ;;  %v1134_v36 = vmax.f32 %v1102_v63, 0.0 }
 0x1ea   : > { %v3028_v21 = vpop.eup %3027  ;;  %v976_v34 = vadd.f32 1e-05, %v912_v13  ;;  %v850_v17 = vmul.f32 0.015625, %v808_v51  ;;  %v1101_v8 = vadd.f32 %v3575_v41, %v1065_v50  ;;  %v1039_v38 = vmul.f32 %v3026_v23, %v943_v3 }
 0x1eb   : > { %3029 = vrsqrt.f32 %v977_v45  ;;  %v915_v56 = vsub.f32 %v851_v20, %v883_v61  ;;  %v1100_v43 = vadd.f32 %v3575_v41, %v1064_v2  ;;  %v1159_v9 = vpack.c.bf16 %v1135_v57, %v1134_v36 }
 0x1ec   : > { %3031 = vrsqrt.f32 %v976_v34  ;;  %v914_v32 = vsub.f32 %v850_v17, %v882_v15  ;;  %v656_v40 = vpop.xlane.xlu1 %655  ;;  %v1133_v16 = vmax.f32 %v1101_v8, 0.0  ;;  %v1038_v53 = vmul.f32 %v3028_v21, %v942_v60 }
 0x1ed   : > { %v979_v19 = vadd.f32 1e-05, %v915_v56  ;;  %v653_v31 = vpop.xlane.xlu0 %652  ;;  %v1132_v37 = vmax.f32 %v1100_v43, 0.0  ;;  %v1075_v48 = vmul.f32 %v3565_v11, %v1039_v38  ;;  %v3766_v35 = vmul.f32 0.015625, %v656_v40 }
 0x1ee   : > { %v978_v42 = vadd.f32 1e-05, %v914_v32  ;;  %v1074_v30 = vmul.f32 %v3565_v11, %v1038_v53  ;;  %v3770_v27 = vmul.f32 0.015625, %v653_v31  ;;  %v944_v1 = vsub.f32 %v3364_v52, %v3732_v24 }
 0x1ef   : > { %3033 = vrsqrt.f32 %v979_v19  ;;  %v1158_v3 = vpack.c.bf16 %v1133_v16, %v1132_v37  ;;  %v1111_v60 = vadd.f32 %v3575_v41, %v1075_v48  ;;  %v885_v62 = vmul.f32 %v3766_v35, %v3766_v35 }
 0x1f0   : > { %3035 = vrsqrt.f32 %v978_v42  ;;  %v662_v29 = vpop.xlane.xlu1 %661  ;;  %v1110_v47 = vadd.f32 %v3575_v41, %v1074_v30  ;;  %v884_v10 = vmul.f32 %v3770_v27, %v3770_v27  ;;  %v947_v45 = vsub.f32 %v3368_v54, %v3748_v18 }
 0x1f1   : > { %v659_v39 = vpop.xlane.xlu0 %658  ;;  %2850 = vmatprep.mubr.msk.bf16.mxu1 %vm566_vm1, %v1158_v3  ;;  %v1143_v33 = vmax.f32 %v1111_v60, 0.0  ;;  %v3783_v26 = vmul.f32 0.015625, %v662_v29  ;;  %v946_v36 = vsub.f32 %v3359_v49, %v3751_v28  ;;  %v949_v29 = vsub.f32 %v3399_v7, %v3766_v35 }
 0x1f2   : > { %2851 = vmatmul.mubr.msk.bf16.gmra.mrb[28].mxu1 %vm566_vm1, %v1159_v9  ;;  %v1142_v44 = vmax.f32 %v1110_v47, 0.0  ;;  %v3785_v50 = vmul.f32 0.015625, %v659_v39  ;;  %v948_v39 = vsub.f32 %v3393_v4, %v3770_v27 }
 0x1f3   : > { %2854 = vmatprep.mubr.msk.bf16.mxu1 %vm566_vm1, %v3633_v22  ;;  %v887_v55 = vmul.f32 %v3783_v26, %v3783_v26 }
 0x1f4   : > { %v817_v25 = vpop.xlane.xlu1 %816  ;;  %v1163_v13 = vpack.c.bf16 %v1143_v33, %v1142_v44  ;;  %v886_v52 = vmul.f32 %v3785_v50, %v3785_v50  ;;  %v951_v33 = vsub.f32 %v3397_v6, %v3783_v26 }
 0x1f5   : > { %v3030_v61 = vpop.eup %3029  ;;  %v814_v63 = vpop.xlane.xlu0 %813  ;;  %v853_v15 = vmul.f32 0.015625, %v817_v25  ;;  %v950_v25 = vsub.f32 %v3386_v0, %v3785_v50 }
 0x1f6   : > { %v3032_v46 = vpop.eup %3031  ;;  %v852_v22 = vmul.f32 0.015625, %v814_v63  ;;  %v1041_v57 = vmul.f32 %v3030_v61, %v945_v5 }
 0x1f7   : > { %v917_v59 = vsub.f32 %v853_v15, %v885_v62  ;;  %v1040_v23 = vmul.f32 %v3032_v46, %v944_v1 }
 0x1f8   : > { %v916_v24 = vsub.f32 %v852_v22, %v884_v10  ;;  %v823_v51 = vpop.xlane.xlu1 %822  ;;  %v1077_v20 = vmul.f32 %v3565_v11, %v1041_v57 }
 0x1f9   : > { %v3034_v2 = vpop.eup %3033  ;;  %v981_v21 = vadd.f32 1e-05, %v917_v59  ;;  %v820_v34 = vpop.xlane.xlu0 %819  ;;  %v855_v17 = vmul.f32 0.015625, %v823_v51  ;;  %v1076_v8 = vmul.f32 %v3565_v11, %v1040_v23 }
 0x1fa   : > { %v3036_v38 = vpop.eup %3035  ;;  %v980_v56 = vadd.f32 1e-05, %v916_v24  ;;  %v854_v43 = vmul.f32 0.015625, %v820_v34  ;;  %2855 = vmatmul.mubr.msk.bf16.gmra.mrb[32].mxu1 %vm566_vm1, %v3608_v58  ;;  %v1113_v54 = vadd.f32 %v3575_v41, %v1077_v20  ;;  %v1043_v18 = vmul.f32 %v3034_v2, %v947_v45 }
 0x1fb   : > { %3037 = vrsqrt.f32 %v981_v21  ;;  %v919_v9 = vsub.f32 %v855_v17, %v887_v55  ;;  %2858 = vmatprep.mubr.msk.bf16.mxu1 %vm566_vm1, %v3698_v12  ;;  %v1112_v49 = vadd.f32 %v3575_v41, %v1076_v8  ;;  %v1042_v28 = vmul.f32 %v3036_v38, %v946_v36 }
 0x1fc   : > { %3039 = vrsqrt.f32 %v980_v56  ;;  %v918_v32 = vsub.f32 %v854_v43, %v886_v52  ;;  %v1145_v40 = vmax.f32 %v1113_v54, 0.0  ;;  %v1079_v16 = vmul.f32 %v3565_v11, %v1043_v18 }
 0x1fd   : > { %v983_v53 = vadd.f32 1e-05, %v919_v9  ;;  %v1144_v19 = vmax.f32 %v1112_v49, 0.0  ;;  %v1078_v58 = vmul.f32 %v3565_v11, %v1042_v28 }
 0x1fe   : > { %v982_v31 = vadd.f32 1e-05, %v918_v32  ;;  %v1115_v37 = vadd.f32 %v3575_v41, %v1079_v16 }
 0x1ff   : > { %3041 = vrsqrt.f32 %v983_v53  ;;  %v1164_v48 = vpack.c.bf16 %v1145_v40, %v1144_v19  ;;  %v1114_v42 = vadd.f32 %v3575_v41, %v1078_v58 }
 0x200   : > { %3043 = vrsqrt.f32 %v982_v31  ;;  %v1147_v12 = vmax.f32 %v1115_v37, 0.0 }
 0x201   : > { %v1146_v30 = vmax.f32 %v1114_v42, 0.0  ;;  %v2978_v42 = vld [vmem:[%s4421_s3 + $0x8] sm:$0xff]  }
 0x202   : > { %2859 = vmatmul.mubr.msk.bf16.gmra.mrb[36].mxu1 %vm566_vm1, %v1163_v13 }
 0x203   : > { %2862 = vmatprep.mubr.msk.bf16.mxu1 %vm566_vm1, %v1164_v48  ;;  %v1165_v3 = vpack.c.bf16 %v1147_v12, %v1146_v30  ;;  %v2977_v48 = vld [vmem:[%s4421_s3] sm:$0xff]  }
 0x204   : > { %2870 = vmatprep.subr.bf16.mxu0 %v2977_v48 }
 0x205   : > { %v3038_v47 = vpop.eup %3037  ;;  %2871 = vmatpush3.bf16.msra.mxu0 %v2977_v48 }
 0x206   : > { %v3040_v60 = vpop.eup %3039  ;;  %v1045_v44 = vmul.f32 %v3038_v47, %v949_v29  ;;  %2872 = vmatprep.subr.bf16.mxu0 %v2978_v42 }
 0x207   : > { %v1044_v62 = vmul.f32 %v3040_v60, %v948_v39  ;;  %v2979_v60 = vld [vmem:[%s4421_s3 + $0x10] sm:$0xff]  }
 0x208   : > { %v1081_v5 = vmul.f32 %v3565_v11, %v1045_v44 }
 0x209   : > { %v3042_v10 = vpop.eup %3041  ;;  %v1080_v61 = vmul.f32 %v3565_v11, %v1044_v62  ;;  %2873 = vmatpush3.bf16.msra.mxu0 %v2978_v42 }
 0x20a   : > { %v3044_v1 = vpop.eup %3043  ;;  %2863 = vmatmul.mubr.msk.bf16.gmra.mrb[40].mxu1 %vm566_vm1, %v1165_v3  ;;  %v1117_v7 = vadd.f32 %v3575_v41, %v1081_v5  ;;  %v1047_v4 = vmul.f32 %v3042_v10, %v951_v33  ;;  %2874 = vmatprep.subr.bf16.mxu0 %v2979_v60  ;;  %v2980_v10 = vld [vmem:[%s4421_s3 + $0x18] sm:$0xff]  }
 0x20b   : > { %v1116_v35 = vadd.f32 %v3575_v41, %v1080_v61  ;;  %v1046_v27 = vmul.f32 %v3044_v1, %v950_v25 }
 0x20c   : > { %v1149_v63 = vmax.f32 %v1117_v7, 0.0  ;;  %v1083_v6 = vmul.f32 %v3565_v11, %v1047_v4 }
 0x20d   : > { %v1148_v26 = vmax.f32 %v1116_v35, 0.0  ;;  %v1082_v15 = vmul.f32 %v3565_v11, %v1046_v27  ;;  %2875 = vmatpush3.bf16.msra.mxu0 %v2979_v60 }
 0x20e   : > { %v1119_v13 = vadd.f32 %v3575_v41, %v1083_v6  ;;  %2876 = vmatprep.subr.bf16.mxu0 %v2980_v10 }
 0x20f   : > { %v1166_v0 = vpack.c.bf16 %v1149_v63, %v1148_v26  ;;  %v1118_v46 = vadd.f32 %v3575_v41, %v1082_v15 }
 0x210   : > { %v1151_v50 = vmax.f32 %v1119_v13, 0.0 }
 0x211   : > { %2866 = vmatprep.mubr.msk.bf16.mxu1 %vm566_vm1, %v1166_v0  ;;  %v1150_v22 = vmax.f32 %v1118_v46, 0.0  ;;  %2877 = vmatpush3.bf16.msra.mxu0 %v2980_v10 }
 0x213   : > { %v1167_v57 = vpack.c.bf16 %v1151_v50, %v1150_v22 }
 0x215   : > { %2867 = vmatmul.mubr.msk.bf16.gmra.mrb[44].mxu1 %vm566_vm1, %v1167_v57 }
 0x285   : > { %v3828_v55 = vpop.f32.mrb[16].mxu1 }
 0x286   : > { %v3830_v59 = vpop.f32.mrb[17].mxu1  ;;  %v1415_v23 = vsel %vm566_vm1, %v3828_v55, 0.0  ;;  %v1539_v24 = vmul.f32 %v3828_v55, %v3828_v55 }
 0x287   : > { %v3834_v11 = vpop.f32.mrb[18].mxu1  ;;  %1416 = vadd.xlane.f32.xlu0 %v1415_v23  ;;  %v1409_v52 = vsel %vm566_vm1, %v3830_v59, 0.0  ;;  %v1537_v36 = vmul.f32 %v3830_v59, %v3830_v59 }
 0x288   : > { %v3836_v45 = vpop.f32.mrb[19].mxu1  ;;  %v1418_v41 = vsel %vm566_vm1, %v3834_v11, 0.0  ;;  %v1540_v20 = vmul.f32 %v3834_v11, %v3834_v11  ;;  %v1575_v2 = vsel %vm566_vm1, %v1539_v24, 0.0 }
 0x289   : > { %1419 = vadd.xlane.f32.xlu1 %v1418_v41  ;;  %v1412_v51 = vsel %vm566_vm1, %v3836_v45, 0.0  ;;  %v1538_v34 = vmul.f32 %v3836_v45, %v3836_v45  ;;  %v1569_v17 = vsel %vm566_vm1, %v1537_v36, 0.0 }
 0x28a   : > { %v1578_v21 = vsel %vm566_vm1, %v1540_v20, 0.0 }
 0x28b   : > { %1410 = vadd.xlane.f32.xlu0 %v1409_v52  ;;  %v1572_v8 = vsel %vm566_vm1, %v1538_v34, 0.0 }
 0x28d   : > { %1413 = vadd.xlane.f32.xlu1 %v1412_v51 }
 0x28f   : > { %1576 = vadd.xlane.f32.xlu0 %v1575_v2 }
 0x291   : > { %1579 = vadd.xlane.f32.xlu1 %v1578_v21 }
 0x293   : > { %1570 = vadd.xlane.f32.xlu0 %v1569_v17 }
 0x295   : > { %1573 = vadd.xlane.f32.xlu1 %v1572_v8 }
 0x2a1   : > { %v3856_v38 = vpop.f32.mrb[20].mxu1 }
 0x2a2   : > { %v3858_v56 = vpop.f32.mrb[21].mxu1  ;;  %v1427_v43 = vsel %vm566_vm1, %v3856_v38, 0.0  ;;  %v1543_v28 = vmul.f32 %v3856_v38, %v3856_v38 }
 0x2a3   : > { %v3862_v54 = vpop.f32.mrb[22].mxu1  ;;  %1428 = vadd.xlane.f32.xlu0 %v1427_v43  ;;  %v1421_v49 = vsel %vm566_vm1, %v3858_v56, 0.0  ;;  %v1541_v53 = vmul.f32 %v3858_v56, %v3858_v56 }
 0x2a4   : > { %v3864_v18 = vpop.f32.mrb[23].mxu1  ;;  %v1430_v9 = vsel %vm566_vm1, %v3862_v54, 0.0  ;;  %v1544_v40 = vmul.f32 %v3862_v54, %v3862_v54  ;;  %v1587_v16 = vsel %vm566_vm1, %v1543_v28, 0.0 }
 0x2a5   : > { %1431 = vadd.xlane.f32.xlu1 %v1430_v9  ;;  %v1424_v32 = vsel %vm566_vm1, %v3864_v18, 0.0  ;;  %v1542_v58 = vmul.f32 %v3864_v18, %v3864_v18  ;;  %v1581_v31 = vsel %vm566_vm1, %v1541_v53, 0.0 }
 0x2a6   : > { %v1590_v19 = vsel %vm566_vm1, %v1544_v40, 0.0 }
 0x2a7   : > { %1422 = vadd.xlane.f32.xlu0 %v1421_v49  ;;  %v1584_v37 = vsel %vm566_vm1, %v1542_v58, 0.0 }
 0x2a9   : > { %1425 = vadd.xlane.f32.xlu1 %v1424_v32 }
 0x2ab   : > { %1588 = vadd.xlane.f32.xlu0 %v1587_v16 }
 0x2ad   : > { %1591 = vadd.xlane.f32.xlu1 %v1590_v19 }
 0x2af   : > { %1582 = vadd.xlane.f32.xlu0 %v1581_v31 }
 0x2b1   : > { %1585 = vadd.xlane.f32.xlu1 %v1584_v37 }
 0x2b5   : > { %v3890_v12 = vpop.f32.mrb[24].mxu1 }
 0x2b6   : > { %v3892_v30 = vpop.f32.mrb[25].mxu1  ;;  %v1439_v3 = vsel %vm566_vm1, %v3890_v12, 0.0  ;;  %v1547_v62 = vmul.f32 %v3890_v12, %v3890_v12 }
 0x2b7   : > { %v3896_v29 = vpop.f32.mrb[26].mxu1  ;;  %1440 = vadd.xlane.f32.xlu0 %v1439_v3  ;;  %v1433_v44 = vsel %vm566_vm1, %v3892_v30, 0.0  ;;  %v1545_v61 = vmul.f32 %v3892_v30, %v3892_v30 }
 0x2b8   : > { %v3898_v47 = vpop.f32.mrb[27].mxu1  ;;  %v1442_v39 = vsel %vm566_vm1, %v3896_v29, 0.0  ;;  %v1548_v5 = vmul.f32 %v3896_v29, %v3896_v29  ;;  %v1599_v25 = vsel %vm566_vm1, %v1547_v62, 0.0 }
 0x2b9   : > { %1443 = vadd.xlane.f32.xlu1 %v1442_v39  ;;  %v1436_v33 = vsel %vm566_vm1, %v3898_v47, 0.0  ;;  %v1546_v7 = vmul.f32 %v3898_v47, %v3898_v47  ;;  %v1593_v4 = vsel %vm566_vm1, %v1545_v61, 0.0 }
 0x2ba   : > { %v1602_v1 = vsel %vm566_vm1, %v1548_v5, 0.0 }
 0x2bb   : > { %1434 = vadd.xlane.f32.xlu0 %v1433_v44  ;;  %v1596_v35 = vsel %vm566_vm1, %v1546_v7, 0.0 }
 0x2bd   : > { %1437 = vadd.xlane.f32.xlu1 %v1436_v33 }
 0x2bf   : > { %1600 = vadd.xlane.f32.xlu0 %v1599_v25 }
 0x2c1   : > { %1603 = vadd.xlane.f32.xlu1 %v1602_v1 }
 0x2c3   : > { %1594 = vadd.xlane.f32.xlu0 %v1593_v4 }
 0x2c5   : > { %1597 = vadd.xlane.f32.xlu1 %v1596_v35  ;;  %v3924_v27 = vpop.f32.mrb[28].mxu1 }
 0x2c6   : > { %v3926_v63 = vpop.f32.mrb[29].mxu1  ;;  %v1451_v6 = vsel %vm566_vm1, %v3924_v27, 0.0  ;;  %v1551_v46 = vmul.f32 %v3924_v27, %v3924_v27 }
 0x2c7   : > { %1452 = vadd.xlane.f32.xlu0 %v1451_v6  ;;  %v3930_v26 = vpop.f32.mrb[30].mxu1  ;;  %v1445_v0 = vsel %vm566_vm1, %v3926_v63, 0.0  ;;  %v1549_v52 = vmul.f32 %v3926_v63, %v3926_v63 }
 0x2c8   : > { %v3932_v15 = vpop.f32.mrb[31].mxu1  ;;  %v1454_v13 = vsel %vm566_vm1, %v3930_v26, 0.0  ;;  %v1552_v22 = vmul.f32 %v3930_v26, %v3930_v26  ;;  %v1611_v41 = vsel %vm566_vm1, %v1551_v46, 0.0 }
 0x2c9   : > { %1455 = vadd.xlane.f32.xlu1 %v1454_v13  ;;  %v1448_v50 = vsel %vm566_vm1, %v3932_v15, 0.0  ;;  %v1550_v2 = vmul.f32 %v3932_v15, %v3932_v15  ;;  %v1605_v36 = vsel %vm566_vm1, %v1549_v52, 0.0 }
 0x2ca   : > { %v1614_v20 = vsel %vm566_vm1, %v1552_v22, 0.0 }
 0x2cb   : > { %1446 = vadd.xlane.f32.xlu0 %v1445_v0  ;;  %v1608_v21 = vsel %vm566_vm1, %v1550_v2, 0.0 }
 0x2cd   : > { %1449 = vadd.xlane.f32.xlu1 %v1448_v50  ;;  %v3944_v57 = vpop.f32.mrb[32].mxu1 }
 0x2ce   : > { %v3946_v23 = vpop.f32.mrb[33].mxu1  ;;  %v1463_v8 = vsel %vm566_vm1, %v3944_v57, 0.0  ;;  %v1555_v28 = vmul.f32 %v3944_v57, %v3944_v57 }
 0x2cf   : > { %1612 = vadd.xlane.f32.xlu0 %v1611_v41  ;;  %v3951_v24 = vpop.f32.mrb[34].mxu1  ;;  %v1457_v32 = vsel %vm566_vm1, %v3946_v23, 0.0  ;;  %v1553_v19 = vmul.f32 %v3946_v23, %v3946_v23 }
 0x2d0   : > { %v3953_v51 = vpop.f32.mrb[35].mxu1  ;;  %v1466_v49 = vsel %vm566_vm1, %v3951_v24, 0.0  ;;  %v1556_v40 = vmul.f32 %v3951_v24, %v3951_v24  ;;  %v1623_v31 = vsel %vm566_vm1, %v1555_v28, 0.0 }
 0x2d1   : > { %1615 = vadd.xlane.f32.xlu1 %v1614_v20  ;;  %v1460_v16 = vsel %vm566_vm1, %v3953_v51, 0.0  ;;  %v1554_v48 = vmul.f32 %v3953_v51, %v3953_v51  ;;  %v1617_v39 = vsel %vm566_vm1, %v1553_v19, 0.0 }
 0x2d2   : > { %v1626_v3 = vsel %vm566_vm1, %v1556_v40, 0.0 }
 0x2d3   : > { %1606 = vadd.xlane.f32.xlu0 %v1605_v36  ;;  %v1620_v60 = vsel %vm566_vm1, %v1554_v48, 0.0 }
 0x2d5   : > { %1609 = vadd.xlane.f32.xlu1 %v1608_v21  ;;  %v3960_v34 = vpop.f32.mrb[36].mxu1 }
 0x2d6   : > { %v3962_v17 = vpop.f32.mrb[37].mxu1  ;;  %v1475_v44 = vsel %vm566_vm1, %v3960_v34, 0.0  ;;  %v1559_v10 = vmul.f32 %v3960_v34, %v3960_v34 }
 0x2d7   : > { %1464 = vadd.xlane.f32.xlu0 %v1463_v8  ;;  %v3966_v43 = vpop.f32.mrb[38].mxu1  ;;  %v1469_v61 = vsel %vm566_vm1, %v3962_v17, 0.0  ;;  %v1557_v35 = vmul.f32 %v3962_v17, %v3962_v17 }
 0x2d8   : > { %v3968_v9 = vpop.f32.mrb[39].mxu1  ;;  %v1478_v33 = vsel %vm566_vm1, %v3966_v43, 0.0  ;;  %v1560_v7 = vmul.f32 %v3966_v43, %v3966_v43  ;;  %v1635_v6 = vsel %vm566_vm1, %v1559_v10, 0.0 }
 0x2d9   : > { %1467 = vadd.xlane.f32.xlu1 %v1466_v49  ;;  %v1472_v4 = vsel %vm566_vm1, %v3968_v9, 0.0  ;;  %v1558_v13 = vmul.f32 %v3968_v9, %v3968_v9  ;;  %v1629_v46 = vsel %vm566_vm1, %v1557_v35, 0.0 }
 0x2da   : > { %v1638_v0 = vsel %vm566_vm1, %v1560_v7, 0.0 }
 0x2db   : > { %1458 = vadd.xlane.f32.xlu0 %v1457_v32  ;;  %v1632_v50 = vsel %vm566_vm1, %v1558_v13, 0.0 }
 0x2dd   : > { %1461 = vadd.xlane.f32.xlu1 %v1460_v16  ;;  %v3980_v53 = vpop.f32.mrb[40].mxu1 }
 0x2de   : > { %v3984_v58 = vpop.f32.mrb[41].mxu1  ;;  %v1487_v22 = vsel %vm566_vm1, %v3980_v53, 0.0  ;;  %v1563_v52 = vmul.f32 %v3980_v53, %v3980_v53 }
 0x2df   : > { %1624 = vadd.xlane.f32.xlu0 %v1623_v31  ;;  %v3987_v37 = vpop.f32.mrb[42].mxu1  ;;  %v1481_v20 = vsel %vm566_vm1, %v3984_v58, 0.0  ;;  %v1561_v21 = vmul.f32 %v3984_v58, %v3984_v58 }
 0x2e0   : > { %v3991_v42 = vpop.f32.mrb[43].mxu1  ;;  %v1490_v41 = vsel %vm566_vm1, %v3987_v37, 0.0  ;;  %v1564_v2 = vmul.f32 %v3987_v37, %v3987_v37  ;;  %v1647_v8 = vsel %vm566_vm1, %v1563_v52, 0.0 }
 0x2e1   : > { %1627 = vadd.xlane.f32.xlu1 %v1626_v3  ;;  %v1484_v36 = vsel %vm566_vm1, %v3991_v42, 0.0  ;;  %v1562_v49 = vmul.f32 %v3991_v42, %v3991_v42  ;;  %v1641_v32 = vsel %vm566_vm1, %v1561_v21, 0.0 }
 0x2e2   : > { %v1650_v28 = vsel %vm566_vm1, %v1564_v2, 0.0 }
 0x2e3   : > { %1618 = vadd.xlane.f32.xlu0 %v1617_v39  ;;  %v1644_v40 = vsel %vm566_vm1, %v1562_v49, 0.0 }
 0x2e5   : > { %1621 = vadd.xlane.f32.xlu1 %v1620_v60 }
 0x2e7   : > { %1476 = vadd.xlane.f32.xlu0 %v1475_v44 }
 0x2e8   : > { %v3998_v62 = vpop.f32.mrb[44].mxu1 }
 0x2e9   : > { %1479 = vadd.xlane.f32.xlu1 %v1478_v33  ;;  %v4002_v5 = vpop.f32.mrb[45].mxu1  ;;  %v1499_v16 = vsel %vm566_vm1, %v3998_v62, 0.0  ;;  %v1567_v60 = vmul.f32 %v3998_v62, %v3998_v62 }
 0x2ea   : > { %v4006_v25 = vpop.f32.mrb[46].mxu1  ;;  %v1565_v31 = vmul.f32 %v4002_v5, %v4002_v5  ;;  %v1493_v48 = vsel %vm566_vm1, %v4002_v5, 0.0 }
 0x2eb   : > { %1470 = vadd.xlane.f32.xlu0 %v1469_v61  ;;  %v4010_v1 = vpop.f32.mrb[47].mxu1  ;;  %v1502_v19 = vsel %vm566_vm1, %v4006_v25, 0.0  ;;  %v1568_v33 = vmul.f32 %v4006_v25, %v4006_v25  ;;  %v1659_v61 = vsel %vm566_vm1, %v1567_v60, 0.0 }
 0x2ec   : > { %v1566_v3 = vmul.f32 %v4010_v1, %v4010_v1  ;;  %v1496_v39 = vsel %vm566_vm1, %v4010_v1, 0.0  ;;  %v1653_v44 = vsel %vm566_vm1, %v1565_v31, 0.0 }
 0x2ed   : > { %1473 = vadd.xlane.f32.xlu1 %v1472_v4  ;;  %v1662_v4 = vsel %vm566_vm1, %v1568_v33, 0.0 }
 0x2ee   : > { %v1656_v10 = vsel %vm566_vm1, %v1566_v3, 0.0 }
 0x2ef   : > { %1636 = vadd.xlane.f32.xlu0 %v1635_v6 }
 0x2f1   : > { %1639 = vadd.xlane.f32.xlu1 %v1638_v0 }
 0x2f3   : > { %1630 = vadd.xlane.f32.xlu0 %v1629_v46 }
 0x2f5   : > { %1633 = vadd.xlane.f32.xlu1 %v1632_v50 }
 0x2f7   : > { %1488 = vadd.xlane.f32.xlu0 %v1487_v22 }
 0x2f9   : > { %1491 = vadd.xlane.f32.xlu1 %v1490_v41 }
 0x2fb   : > { %1482 = vadd.xlane.f32.xlu0 %v1481_v20 }
 0x2fd   : > { %1485 = vadd.xlane.f32.xlu1 %v1484_v36 }
 0x2ff   : > { %1648 = vadd.xlane.f32.xlu0 %v1647_v8 }
 0x301   : > { %1651 = vadd.xlane.f32.xlu1 %v1650_v28 }
 0x303   : > { %1642 = vadd.xlane.f32.xlu0 %v1641_v32 }
 0x305   : > { %1645 = vadd.xlane.f32.xlu1 %v1644_v40 }
 0x307   : > { %1500 = vadd.xlane.f32.xlu0 %v1499_v16 }
 0x309   : > { %1503 = vadd.xlane.f32.xlu1 %v1502_v19 }
 0x30b   : > { %1494 = vadd.xlane.f32.xlu0 %v1493_v48 }
 0x30d   : > { %1497 = vadd.xlane.f32.xlu1 %v1496_v39 }
 0x30f   : > { %1654 = vadd.xlane.f32.xlu0 %v1653_v44 }
 0x311   : > { %1657 = vadd.xlane.f32.xlu1 %v1656_v10  ;;  %v1891_v10 = vsub.s32 2, %v3545_v14 }
 0x313   : > { %1660 = vadd.xlane.f32.xlu0 %v1659_v61  ;;  %v1927_v61 = vsub.s32 3, %v3545_v14 }
 0x314   : > { %v1417_v7 = vpop.xlane.xlu0 %1416 }
 0x315   : > { %1663 = vadd.xlane.f32.xlu1 %v1662_v4  ;;  %v1507_v13 = vmul.f32 0.015625, %v1417_v7  ;;  %v4070_v4 = vld [vmem:[%s4422_s4] sm:$0x1f] }
 0x316   : > { %v1420_v35 = vpop.xlane.xlu1 %1419 }
 0x317   : > { %v1508_v46 = vmul.f32 0.015625, %v1420_v35  ;;  %v1699_v22 = vmul.f32 %v1507_v13, %v1507_v13  ;;  %v1763_v7 = vsub.f32 %v3828_v55, %v1507_v13  ;;  %v4073_v35 = vrot.slane %v4070_v4, %v1891_v10 }
 0x318   : > { %v1411_v6 = vpop.xlane.xlu0 %1410 }
 0x319   : > { %v1505_v41 = vmul.f32 0.015625, %v1411_v6  ;;  %v1700_v36 = vmul.f32 %v1508_v46, %v1508_v46 }
 0x31a   : > { %v1414_v0 = vpop.xlane.xlu1 %1413 }
 0x31b   : > { %v1506_v20 = vmul.f32 0.015625, %v1414_v0  ;;  %v1697_v28 = vmul.f32 %v1505_v41, %v1505_v41  ;;  %v1764_v0 = vsub.f32 %v3834_v11, %v1508_v46 }
 0x31c   : > { %v1577_v50 = vpop.xlane.xlu0 %1576 }
 0x31d   : > { %v1667_v52 = vmul.f32 0.015625, %v1577_v50  ;;  %v1698_v19 = vmul.f32 %v1506_v20, %v1506_v20  ;;  %v4077_v50 = vrot.slane %v4070_v4, %v1927_v61 }
 0x31e   : > { %v1580_v2 = vpop.xlane.xlu1 %1579 }
 0x31f   : > { %v1731_v21 = vsub.f32 %v1667_v52, %v1699_v22  ;;  %v1668_v8 = vmul.f32 0.015625, %v1580_v2  ;;  %v1761_v2 = vsub.f32 %v3830_v59, %v1505_v41 }
 0x320   : > { %v1571_v49 = vpop.xlane.xlu0 %1570 }
 0x321   : > { %v1795_v32 = vadd.f32 1e-05, %v1731_v21  ;;  %v1732_v40 = vsub.f32 %v1668_v8, %v1700_v36  ;;  %v1665_v16 = vmul.f32 0.015625, %v1571_v49  ;;  %v1762_v8 = vsub.f32 %v3836_v45, %v1506_v20 }
 0x322   : > { %v1574_v31 = vpop.xlane.xlu1 %1573 }
 0x323   : > { %3045 = vrsqrt.f32 %v1795_v32  ;;  %v1796_v48 = vadd.f32 1e-05, %v1732_v40  ;;  %v1729_v3 = vsub.f32 %v1665_v16, %v1697_v28  ;;  %v1666_v39 = vmul.f32 0.015625, %v1574_v31 }
 0x325   : > { %3047 = vrsqrt.f32 %v1796_v48  ;;  %v1793_v60 = vadd.f32 1e-05, %v1729_v3  ;;  %v1730_v44 = vsub.f32 %v1666_v39, %v1698_v19 }
 0x327   : > { %3049 = vrsqrt.f32 %v1793_v60  ;;  %v1794_v33 = vadd.f32 1e-05, %v1730_v44 }
 0x329   : > { %3051 = vrsqrt.f32 %v1794_v33 }
 0x32d   : > { %v3046_v6 = vpop.eup %3045 }
 0x32e   : > { %v1859_v22 = vmul.f32 %v3046_v6, %v1763_v7 }
 0x32f   : > { %v3048_v52 = vpop.eup %3047 }
 0x330   : > { %v1895_v55 = vmul.f32 %v4073_v35, %v1859_v22  ;;  %v1860_v13 = vmul.f32 %v3048_v52, %v1764_v0  ;;  %v1429_v36 = vpop.xlane.xlu0 %1428 }
 0x331   : > { %v3050_v21 = vpop.eup %3049  ;;  %v1511_v41 = vmul.f32 0.015625, %v1429_v36 }
 0x332   : > { %v1931_v49 = vadd.f32 %v4077_v50, %v1895_v55  ;;  %v1896_v28 = vmul.f32 %v4073_v35, %v1860_v13  ;;  %v1432_v32 = vpop.xlane.xlu1 %1431  ;;  %v1857_v11 = vmul.f32 %v3050_v21, %v1761_v2 }
 0x333   : > { %v3052_v46 = vpop.eup %3051  ;;  %v1512_v20 = vmul.f32 0.015625, %v1432_v32  ;;  %v1703_v10 = vmul.f32 %v1511_v41, %v1511_v41 }
 0x334   : > { %v1932_v40 = vadd.f32 %v4077_v50, %v1896_v28  ;;  %v1423_v16 = vpop.xlane.xlu0 %1422  ;;  %v1858_v19 = vmul.f32 %v3052_v46, %v1762_v8  ;;  %v1893_v59 = vmul.f32 %v4073_v35, %v1857_v11  ;;  %v1963_v31 = vmax.f32 %v1931_v49, 0.0 }
 0x335   : > { %v1509_v61 = vmul.f32 0.015625, %v1423_v16  ;;  %v1704_v2 = vmul.f32 %v1512_v20, %v1512_v20 }
 0x336   : > { %v1964_v48 = vmax.f32 %v1932_v40, 0.0  ;;  %v1426_v3 = vpop.xlane.xlu1 %1425  ;;  %v1894_v39 = vmul.f32 %v4073_v35, %v1858_v19  ;;  %v1929_v45 = vadd.f32 %v4077_v50, %v1893_v59 }
 0x337   : > { %v1510_v6 = vmul.f32 0.015625, %v1426_v3  ;;  %v1701_v8 = vmul.f32 %v1509_v61, %v1509_v61 }
 0x338   : > { %v1589_v60 = vpop.xlane.xlu0 %1588  ;;  %v1930_v44 = vadd.f32 %v4077_v50, %v1894_v39  ;;  %v1994_v33 = vpack.c.bf16 %v1964_v48, %v1963_v31  ;;  %v1961_v22 = vmax.f32 %v1929_v45, 0.0  ;;  %v1767_v45 = vsub.f32 %v3856_v38, %v1511_v41 }
 0x339   : > { %v1671_v7 = vmul.f32 0.015625, %v1589_v60  ;;  %v1702_v11 = vmul.f32 %v1510_v6, %v1510_v6 }
 0x33a   : > { %v1592_v0 = vpop.xlane.xlu1 %1591  ;;  %v1962_v52 = vmax.f32 %v1930_v44, 0.0 }
 0x33b   : > { %v1735_v55 = vsub.f32 %v1671_v7, %v1703_v10  ;;  %v1672_v13 = vmul.f32 0.015625, %v1592_v0  ;;  %v1768_v7 = vsub.f32 %v3862_v54, %v1512_v20  ;;  %v1766_v20 = vsub.f32 %v3864_v18, %v1510_v6 }
 0x33c   : > { %v1583_v36 = vpop.xlane.xlu0 %1582  ;;  %v1993_v21 = vpack.c.bf16 %v1962_v52, %v1961_v22 }
 0x33d   : > { %v1799_v49 = vadd.f32 1e-05, %v1735_v55  ;;  %v1736_v28 = vsub.f32 %v1672_v13, %v1704_v2  ;;  %v1669_v32 = vmul.f32 0.015625, %v1583_v36  ;;  %v1765_v2 = vsub.f32 %v3858_v56, %v1509_v61 }
 0x33e   : > { %2878 = vmatprep.mubr.msk.bf16.mxu0 %vm566_vm1, %v1993_v21  ;;  %v1586_v46 = vpop.xlane.xlu1 %1585 }
 0x33f   : > { %3053 = vrsqrt.f32 %v1799_v49  ;;  %v1800_v40 = vadd.f32 1e-05, %v1736_v28  ;;  %v1733_v16 = vsub.f32 %v1669_v32, %v1701_v8  ;;  %v1670_v19 = vmul.f32 0.015625, %v1586_v46  ;;  %2879 = vmatmul.mubr.msk.bf16.vlgmr.msra.gmra.mrb[16].mxu0 %vm566_vm1, %v1994_v33 }
 0x341   : > { %3055 = vrsqrt.f32 %v1800_v40  ;;  %v1797_v59 = vadd.f32 1e-05, %v1733_v16  ;;  %v1734_v31 = vsub.f32 %v1670_v19, %v1702_v11 }
 0x343   : > { %3057 = vrsqrt.f32 %v1797_v59  ;;  %v1798_v48 = vadd.f32 1e-05, %v1734_v31 }
 0x344   : > { %v1441_v3 = vpop.xlane.xlu0 %1440 }
 0x345   : > { %3059 = vrsqrt.f32 %v1798_v48  ;;  %v4092_v10 = vmul.f32 0.015625, %v1441_v3 }
 0x346   : > { %v1444_v39 = vpop.xlane.xlu1 %1443 }
 0x347   : > { %v4095_v33 = vmul.f32 0.015625, %v1444_v39  ;;  %v1707_v41 = vmul.f32 %v4092_v10, %v4092_v10 }
 0x348   : > { %v1435_v60 = vpop.xlane.xlu0 %1434 }
 0x349   : > { %v3054_v44 = vpop.eup %3053  ;;  %v4098_v55 = vmul.f32 0.015625, %v1435_v60  ;;  %v1708_v11 = vmul.f32 %v4095_v33, %v4095_v33 }
 0x34a   : > { %v1438_v0 = vpop.xlane.xlu1 %1437  ;;  %v1863_v22 = vmul.f32 %v3054_v44, %v1767_v45 }
 0x34b   : > { %v3056_v52 = vpop.eup %3055  ;;  %v4103_v8 = vmul.f32 0.015625, %v1438_v0  ;;  %v1705_v16 = vmul.f32 %v4098_v55, %v4098_v55 }
 0x34c   : > { %v1601_v13 = vpop.xlane.xlu0 %1600  ;;  %v1864_v36 = vmul.f32 %v3056_v52, %v1768_v7  ;;  %v1899_v21 = vmul.f32 %v4073_v35, %v1863_v22 }
 0x34d   : > { %v3058_v38 = vpop.eup %3057  ;;  %v1675_v54 = vmul.f32 0.015625, %v1601_v13  ;;  %v1706_v6 = vmul.f32 %v4103_v8, %v4103_v8 }
 0x34e   : > { %v1604_v49 = vpop.xlane.xlu1 %1603  ;;  %v1861_v28 = vmul.f32 %v3058_v38, %v1765_v2  ;;  %v1900_v32 = vmul.f32 %v4073_v35, %v1864_v36  ;;  %v1935_v56 = vadd.f32 %v4077_v50, %v1899_v21 }
 0x34f   : > { %v3060_v61 = vpop.eup %3059  ;;  %v1739_v46 = vsub.f32 %v1675_v54, %v1707_v41  ;;  %v1676_v40 = vmul.f32 0.015625, %v1604_v49 }
 0x350   : > { %v1595_v19 = vpop.xlane.xlu0 %1594  ;;  %v1862_v59 = vmul.f32 %v3060_v61, %v1766_v20  ;;  %v1897_v31 = vmul.f32 %v4073_v35, %v1861_v28  ;;  %v1936_v18 = vadd.f32 %v4077_v50, %v1900_v32  ;;  %v1967_v7 = vmax.f32 %v1935_v56, 0.0 }
 0x351   : > { %v1803_v48 = vadd.f32 1e-05, %v1739_v46  ;;  %v1740_v3 = vsub.f32 %v1676_v40, %v1708_v11  ;;  %v1673_v39 = vmul.f32 0.015625, %v1595_v19  ;;  %v1771_v40 = vsub.f32 %v3890_v12, %v4092_v10 }
 0x352   : > { %v1598_v45 = vpop.xlane.xlu1 %1597  ;;  %v1898_v60 = vmul.f32 %v4073_v35, %v1862_v59  ;;  %v1933_v44 = vadd.f32 %v4077_v50, %v1897_v31  ;;  %v1968_v0 = vmax.f32 %v1936_v18, 0.0 }
 0x353   : > { %3061 = vrsqrt.f32 %v1803_v48  ;;  %v1804_v22 = vadd.f32 1e-05, %v1740_v3  ;;  %v1737_v52 = vsub.f32 %v1673_v39, %v1705_v16  ;;  %v1674_v2 = vmul.f32 0.015625, %v1598_v45 }
 0x354   : > { %v1453_v13 = vpop.xlane.xlu0 %1452  ;;  %v1934_v36 = vadd.f32 %v4077_v50, %v1898_v60  ;;  %v1996_v21 = vpack.c.bf16 %v1968_v0, %v1967_v7  ;;  %v1965_v20 = vmax.f32 %v1933_v44, 0.0  ;;  %v1769_v44 = vsub.f32 %v3892_v30, %v4098_v55 }
 0x355   : > { %3063 = vrsqrt.f32 %v1804_v22  ;;  %v1801_v38 = vadd.f32 1e-05, %v1737_v52  ;;  %v1738_v41 = vsub.f32 %v1674_v2, %v1706_v6  ;;  %v4119_v56 = vmul.f32 0.015625, %v1453_v13 }
 0x356   : > { %v1456_v54 = vpop.xlane.xlu1 %1455  ;;  %v1966_v49 = vmax.f32 %v1934_v36, 0.0  ;;  %v1772_v6 = vsub.f32 %v3896_v29, %v4095_v33  ;;  %v1770_v7 = vsub.f32 %v3898_v47, %v4103_v8 }
 0x357   : > { %3065 = vrsqrt.f32 %v1801_v38  ;;  %v1802_v28 = vadd.f32 1e-05, %v1738_v41  ;;  %v4122_v46 = vmul.f32 0.015625, %v1456_v54  ;;  %v1711_v59 = vmul.f32 %v4119_v56, %v4119_v56 }
 0x358   : > { %v1447_v32 = vpop.xlane.xlu0 %1446  ;;  %v1995_v61 = vpack.c.bf16 %v1966_v49, %v1965_v20 }
 0x359   : > { %3067 = vrsqrt.f32 %v1802_v28  ;;  %v4129_v31 = vmul.f32 0.015625, %v1447_v32  ;;  %v1712_v60 = vmul.f32 %v4122_v46, %v4122_v46 }
 0x35a   : > { %2882 = vmatprep.mubr.msk.bf16.mxu0 %vm566_vm1, %v1995_v61  ;;  %v1450_v11 = vpop.xlane.xlu1 %1449 }
 0x35b   : > { %2883 = vmatmul.mubr.msk.bf16.gmra.mrb[20].mxu0 %vm566_vm1, %v1996_v21  ;;  %v4133_v48 = vmul.f32 0.015625, %v1450_v11  ;;  %v1709_v52 = vmul.f32 %v4129_v31, %v4129_v31 }
 0x35c   : > { %v1613_v16 = vpop.xlane.xlu0 %1612 }
 0x35d   : > { %v3062_v19 = vpop.eup %3061  ;;  %v1679_v18 = vmul.f32 0.015625, %v1613_v16  ;;  %v1710_v21 = vmul.f32 %v4133_v48, %v4133_v48 }
 0x35e   : > { %v1616_v3 = vpop.xlane.xlu1 %1615  ;;  %v1867_v39 = vmul.f32 %v3062_v19, %v1771_v40 }
 0x35f   : > { %v3064_v45 = vpop.eup %3063  ;;  %v1743_v12 = vsub.f32 %v1679_v18, %v1711_v59  ;;  %v1680_v10 = vmul.f32 0.015625, %v1616_v3 }
 0x360   : > { %v1607_v0 = vpop.xlane.xlu0 %1606  ;;  %v1868_v22 = vmul.f32 %v3064_v45, %v1772_v6  ;;  %v1903_v29 = vmul.f32 %v4073_v35, %v1867_v39 }
 0x361   : > { %v3066_v33 = vpop.eup %3065  ;;  %v1807_v2 = vadd.f32 1e-05, %v1743_v12  ;;  %v1744_v13 = vsub.f32 %v1680_v10, %v1712_v60  ;;  %v1677_v36 = vmul.f32 0.015625, %v1607_v0 }
 0x362   : > { %v1610_v38 = vpop.xlane.xlu1 %1609  ;;  %v1865_v41 = vmul.f32 %v3066_v33, %v1769_v44  ;;  %v1904_v30 = vmul.f32 %v4073_v35, %v1868_v22  ;;  %v1939_v47 = vadd.f32 %v4077_v50, %v1903_v29  ;;  %v1775_v22 = vsub.f32 %v3924_v27, %v4119_v56 }
 0x363   : > { %v3068_v55 = vpop.eup %3067  ;;  %3069 = vrsqrt.f32 %v1807_v2  ;;  %v1808_v8 = vadd.f32 1e-05, %v1744_v13  ;;  %v1741_v54 = vsub.f32 %v1677_v36, %v1709_v52  ;;  %v1678_v20 = vmul.f32 0.015625, %v1610_v38 }
 0x364   : > { %v1465_v49 = vpop.xlane.xlu0 %1464  ;;  %v1866_v28 = vmul.f32 %v3068_v55, %v1770_v7  ;;  %v1901_v32 = vmul.f32 %v4073_v35, %v1865_v41  ;;  %v1940_v61 = vadd.f32 %v4077_v50, %v1904_v30  ;;  %v1971_v18 = vmax.f32 %v1939_v47, 0.0 }
 0x365   : > { %3071 = vrsqrt.f32 %v1808_v8  ;;  %v1805_v11 = vadd.f32 1e-05, %v1741_v54  ;;  %v1742_v40 = vsub.f32 %v1678_v20, %v1710_v21  ;;  %v4153_v12 = vmul.f32 0.015625, %v1465_v49 }
 0x366   : > { %v1468_v16 = vpop.xlane.xlu1 %1467  ;;  %v1902_v19 = vmul.f32 %v4073_v35, %v1866_v28  ;;  %v1937_v59 = vadd.f32 %v4077_v50, %v1901_v32  ;;  %v1972_v6 = vmax.f32 %v1940_v61, 0.0  ;;  %v1776_v21 = vsub.f32 %v3930_v26, %v4122_v46 }
 0x367   : > { %3073 = vrsqrt.f32 %v1805_v11  ;;  %v1806_v3 = vadd.f32 1e-05, %v1742_v40  ;;  %v4155_v0 = vmul.f32 0.015625, %v1468_v16  ;;  %v1715_v2 = vmul.f32 %v4153_v12, %v4153_v12 }
 0x368   : > { %v1459_v39 = vpop.xlane.xlu0 %1458  ;;  %v1938_v45 = vadd.f32 %v4077_v50, %v1902_v19  ;;  %v1998_v60 = vpack.c.bf16 %v1972_v6, %v1971_v18  ;;  %v1969_v44 = vmax.f32 %v1937_v59, 0.0  ;;  %v1773_v8 = vsub.f32 %v3926_v63, %v4129_v31 }
 0x369   : > { %3075 = vrsqrt.f32 %v1806_v3  ;;  %v4161_v13 = vmul.f32 0.015625, %v1459_v39  ;;  %v1716_v27 = vmul.f32 %v4155_v0, %v4155_v0  ;;  %v1774_v26 = vsub.f32 %v3932_v15, %v4133_v48 }
 0x36a   : > { %v1462_v10 = vpop.xlane.xlu1 %1461  ;;  %v1970_v7 = vmax.f32 %v1938_v45, 0.0 }
 0x36b   : > { %v4165_v38 = vmul.f32 0.015625, %v1462_v10  ;;  %v1713_v28 = vmul.f32 %v4161_v13, %v4161_v13 }
 0x36c   : > { %v1625_v29 = vpop.xlane.xlu0 %1624  ;;  %v1997_v33 = vpack.c.bf16 %v1970_v7, %v1969_v44 }
 0x36d   : > { %v3070_v52 = vpop.eup %3069  ;;  %v1683_v36 = vmul.f32 0.015625, %v1625_v29  ;;  %v1714_v40 = vmul.f32 %v4165_v38, %v4165_v38 }
 0x36e   : > { %2886 = vmatprep.mubr.msk.bf16.mxu0 %vm566_vm1, %v1997_v33  ;;  %v1628_v41 = vpop.xlane.xlu1 %1627  ;;  %v1871_v30 = vmul.f32 %v3070_v52, %v1775_v22 }
 0x36f   : > { %v3072_v47 = vpop.eup %3071  ;;  %v1747_v56 = vsub.f32 %v1683_v36, %v1715_v2  ;;  %v1684_v55 = vmul.f32 0.015625, %v1628_v41  ;;  %2887 = vmatmul.mubr.msk.bf16.gmra.mrb[24].mxu0 %vm566_vm1, %v1998_v60 }
 0x370   : > { %v1619_v46 = vpop.xlane.xlu0 %1618  ;;  %v1872_v54 = vmul.f32 %v3072_v47, %v1776_v21  ;;  %v1907_v20 = vmul.f32 %v4073_v35, %v1871_v30 }
 0x371   : > { %v3074_v49 = vpop.eup %3073  ;;  %v1811_v32 = vadd.f32 1e-05, %v1747_v56  ;;  %v1748_v61 = vsub.f32 %v1684_v55, %v1716_v27  ;;  %v1681_v11 = vmul.f32 0.015625, %v1619_v46  ;;  %v1779_v55 = vsub.f32 %v3944_v57, %v4153_v12 }
 0x372   : > { %v1622_v16 = vpop.xlane.xlu1 %1621  ;;  %v1869_v19 = vmul.f32 %v3074_v49, %v1773_v8  ;;  %v1908_v63 = vmul.f32 %v4073_v35, %v1872_v54  ;;  %v1943_v15 = vadd.f32 %v4077_v50, %v1907_v20 }
 0x373   : > { %v3076_v31 = vpop.eup %3075  ;;  %3077 = vrsqrt.f32 %v1811_v32  ;;  %v1812_v48 = vadd.f32 1e-05, %v1748_v61  ;;  %v1745_v59 = vsub.f32 %v1681_v11, %v1713_v28  ;;  %v1682_v18 = vmul.f32 0.015625, %v1622_v16 }
 0x374   : > { %v1477_v6 = vpop.xlane.xlu0 %1476  ;;  %v1870_v3 = vmul.f32 %v3076_v31, %v1774_v26  ;;  %v1905_v39 = vmul.f32 %v4073_v35, %v1869_v19  ;;  %v1944_v45 = vadd.f32 %v4077_v50, %v1908_v63  ;;  %v1975_v29 = vmax.f32 %v1943_v15, 0.0 }
 0x375   : > { %3079 = vrsqrt.f32 %v1812_v48  ;;  %v1809_v60 = vadd.f32 1e-05, %v1745_v59  ;;  %v1746_v10 = vsub.f32 %v1682_v18, %v1714_v40  ;;  %v4187_v41 = vmul.f32 0.015625, %v1477_v6 }
 0x376   : > { %v1480_v44 = vpop.xlane.xlu1 %1479  ;;  %v1906_v7 = vmul.f32 %v4073_v35, %v1870_v3  ;;  %v1941_v22 = vadd.f32 %v4077_v50, %v1905_v39  ;;  %v1976_v33 = vmax.f32 %v1944_v45, 0.0  ;;  %v1780_v28 = vsub.f32 %v3951_v24, %v4155_v0 }
 0x377   : > { %3081 = vrsqrt.f32 %v1809_v60  ;;  %v1810_v52 = vadd.f32 1e-05, %v1746_v10  ;;  %v4189_v56 = vmul.f32 0.015625, %v1480_v44  ;;  %v1719_v54 = vmul.f32 %v4187_v41, %v4187_v41 }
 0x378   : > { %v1471_v2 = vpop.xlane.xlu0 %1470  ;;  %v1942_v36 = vadd.f32 %v4077_v50, %v1906_v7  ;;  %v2000_v21 = vpack.c.bf16 %v1976_v33, %v1975_v29  ;;  %v1973_v47 = vmax.f32 %v1941_v22, 0.0  ;;  %v1777_v19 = vsub.f32 %v3946_v23, %v4161_v13 }
 0x379   : > { %3083 = vrsqrt.f32 %v1810_v52  ;;  %v4195_v20 = vmul.f32 0.015625, %v1471_v2  ;;  %v1720_v57 = vmul.f32 %v4189_v56, %v4189_v56  ;;  %v1778_v24 = vsub.f32 %v3953_v51, %v4165_v38 }
 0x37a   : > { %v1474_v30 = vpop.xlane.xlu1 %1473  ;;  %v1974_v27 = vmax.f32 %v1942_v36, 0.0 }
 0x37b   : > { %v4199_v32 = vmul.f32 0.015625, %v1474_v30  ;;  %v1717_v48 = vmul.f32 %v4195_v20, %v4195_v20 }
 0x37c   : > { %v1637_v8 = vpop.xlane.xlu0 %1636  ;;  %v1999_v26 = vpack.c.bf16 %v1974_v27, %v1973_v47 }
 0x37d   : > { %v3078_v46 = vpop.eup %3077  ;;  %v1687_v49 = vmul.f32 0.015625, %v1637_v8  ;;  %v1718_v3 = vmul.f32 %v4199_v32, %v4199_v32 }
 0x37e   : > { %2890 = vmatprep.mubr.msk.bf16.mxu0 %vm566_vm1, %v1999_v26  ;;  %v1640_v61 = vpop.xlane.xlu1 %1639  ;;  %v1875_v11 = vmul.f32 %v3078_v46, %v1779_v55 }
 0x37f   : > { %v3080_v40 = vpop.eup %3079  ;;  %v1751_v12 = vsub.f32 %v1687_v49, %v1719_v54  ;;  %v1688_v16 = vmul.f32 0.015625, %v1640_v61  ;;  %2891 = vmatmul.mubr.msk.bf16.gmra.mrb[28].mxu0 %vm566_vm1, %v2000_v21 }
 0x380   : > { %v1631_v0 = vpop.xlane.xlu0 %1630  ;;  %v1876_v63 = vmul.f32 %v3080_v40, %v1780_v28  ;;  %v1911_v15 = vmul.f32 %v4073_v35, %v1875_v11  ;;  %v1783_v11 = vsub.f32 %v3960_v34, %v4187_v41 }
 0x381   : > { %v3082_v31 = vpop.eup %3081  ;;  %v1815_v59 = vadd.f32 1e-05, %v1751_v12  ;;  %v1752_v18 = vsub.f32 %v1688_v16, %v1720_v57  ;;  %v1685_v6 = vmul.f32 0.015625, %v1631_v0  ;;  %v1784_v0 = vsub.f32 %v3966_v43, %v4189_v56 }
 0x382   : > { %v1634_v39 = vpop.xlane.xlu1 %1633  ;;  %v1873_v45 = vmul.f32 %v3082_v31, %v1777_v19  ;;  %v1912_v23 = vmul.f32 %v4073_v35, %v1876_v63  ;;  %v1947_v51 = vadd.f32 %v4077_v50, %v1911_v15  ;;  %v1782_v43 = vsub.f32 %v3968_v9, %v4199_v32 }
 0x383   : > { %v3084_v13 = vpop.eup %3083  ;;  %3085 = vrsqrt.f32 %v1815_v59  ;;  %v1816_v38 = vadd.f32 1e-05, %v1752_v18  ;;  %v1749_v60 = vsub.f32 %v1685_v6, %v1717_v48  ;;  %v1686_v10 = vmul.f32 0.015625, %v1634_v39 }
 0x384   : > { %v1489_v44 = vpop.xlane.xlu0 %1488  ;;  %v1874_v7 = vmul.f32 %v3084_v13, %v1778_v24  ;;  %v1909_v22 = vmul.f32 %v4073_v35, %v1873_v45  ;;  %v1948_v29 = vadd.f32 %v4077_v50, %v1912_v23  ;;  %v1979_v30 = vmax.f32 %v1947_v51, 0.0 }
 0x385   : > { %3087 = vrsqrt.f32 %v1816_v38  ;;  %v1813_v33 = vadd.f32 1e-05, %v1749_v60  ;;  %v1750_v52 = vsub.f32 %v1686_v10, %v1718_v3  ;;  %v4221_v46 = vmul.f32 0.015625, %v1489_v44 }
 0x386   : > { %v1492_v2 = vpop.xlane.xlu1 %1491  ;;  %v1910_v36 = vmul.f32 %v4073_v35, %v1874_v7  ;;  %v1945_v21 = vadd.f32 %v4077_v50, %v1909_v22  ;;  %v1980_v47 = vmax.f32 %v1948_v29, 0.0  ;;  %v1781_v18 = vsub.f32 %v3962_v17, %v4195_v20 }
 0x387   : > { %3089 = vrsqrt.f32 %v1813_v33  ;;  %v1814_v27 = vadd.f32 1e-05, %v1750_v52  ;;  %v4223_v61 = vmul.f32 0.015625, %v1492_v2  ;;  %v1723_v16 = vmul.f32 %v4221_v46, %v4221_v46 }
 0x388   : > { %v1483_v55 = vpop.xlane.xlu0 %1482  ;;  %v1946_v8 = vadd.f32 %v4077_v50, %v1910_v36  ;;  %v2002_v26 = vpack.c.bf16 %v1980_v47, %v1979_v30  ;;  %v1977_v49 = vmax.f32 %v1945_v21, 0.0 }
 0x389   : > { %3091 = vrsqrt.f32 %v1814_v27  ;;  %v4229_v19 = vmul.f32 0.015625, %v1483_v55  ;;  %v1724_v34 = vmul.f32 %v4223_v61, %v4223_v61 }
 0x38a   : > { %v1486_v54 = vpop.xlane.xlu1 %1485  ;;  %v1978_v28 = vmax.f32 %v1946_v8, 0.0 }
 0x38b   : > { %v4233_v63 = vmul.f32 0.015625, %v1486_v54  ;;  %v1721_v45 = vmul.f32 %v4229_v19, %v4229_v19 }
 0x38c   : > { %v1649_v40 = vpop.xlane.xlu0 %1648  ;;  %v2001_v57 = vpack.c.bf16 %v1978_v28, %v1977_v49 }
 0x38d   : > { %v3086_v12 = vpop.eup %3085  ;;  %v1691_v24 = vmul.f32 0.015625, %v1649_v40  ;;  %v1722_v38 = vmul.f32 %v4233_v63, %v4233_v63 }
 0x38e   : > { %2894 = vmatprep.mubr.msk.bf16.mxu0 %vm566_vm1, %v2001_v57  ;;  %v1652_v15 = vpop.xlane.xlu1 %1651  ;;  %v1879_v31 = vmul.f32 %v3086_v12, %v1783_v11 }
 0x38f   : > { %v3088_v48 = vpop.eup %3087  ;;  %v1755_v41 = vsub.f32 %v1691_v24, %v1723_v16  ;;  %v1692_v59 = vmul.f32 0.015625, %v1652_v15  ;;  %2895 = vmatmul.mubr.msk.bf16.gmra.mrb[32].mxu0 %vm566_vm1, %v2002_v26  ;;  %v1787_v16 = vsub.f32 %v3980_v53, %v4221_v46 }
 0x390   : > { %v1643_v56 = vpop.xlane.xlu0 %1642  ;;  %v1880_v6 = vmul.f32 %v3088_v48, %v1784_v0  ;;  %v1915_v3 = vmul.f32 %v4073_v35, %v1879_v31 }
 0x391   : > { %v3090_v39 = vpop.eup %3089  ;;  %v1819_v23 = vadd.f32 1e-05, %v1755_v41  ;;  %v1756_v51 = vsub.f32 %v1692_v59, %v1724_v34  ;;  %v1689_v13 = vmul.f32 0.015625, %v1643_v56  ;;  %v1788_v41 = vsub.f32 %v3987_v37, %v4223_v61 }
 0x392   : > { %v1646_v60 = vpop.xlane.xlu1 %1645  ;;  %v1877_v10 = vmul.f32 %v3090_v39, %v1781_v18  ;;  %v1916_v17 = vmul.f32 %v4073_v35, %v1880_v6  ;;  %v1951_v9 = vadd.f32 %v4077_v50, %v1915_v3  ;;  %v1785_v3 = vsub.f32 %v3984_v58, %v4229_v19 }
 0x393   : > { %v3092_v20 = vpop.eup %3091  ;;  %3093 = vrsqrt.f32 %v1819_v23  ;;  %v1820_v32 = vadd.f32 1e-05, %v1756_v51  ;;  %v1753_v44 = vsub.f32 %v1689_v13, %v1721_v45  ;;  %v1690_v7 = vmul.f32 0.015625, %v1646_v60 }
 0x394   : > { %v1501_v22 = vpop.xlane.xlu0 %1500  ;;  %v1878_v29 = vmul.f32 %v3092_v20, %v1782_v43  ;;  %v1913_v33 = vmul.f32 %v4073_v35, %v1877_v10  ;;  %v1952_v52 = vadd.f32 %v4077_v50, %v1916_v17  ;;  %v1983_v27 = vmax.f32 %v1951_v9, 0.0 }
 0x395   : > { %3095 = vrsqrt.f32 %v1820_v32  ;;  %v1817_v2 = vadd.f32 1e-05, %v1753_v44  ;;  %v1754_v36 = vsub.f32 %v1690_v7, %v1722_v38  ;;  %v4261_v31 = vmul.f32 0.015625, %v1501_v22 }
 0x396   : > { %v1504_v21 = vpop.xlane.xlu1 %1503  ;;  %v1914_v30 = vmul.f32 %v4073_v35, %v1878_v29  ;;  %v1949_v47 = vadd.f32 %v4077_v50, %v1913_v33  ;;  %v1984_v55 = vmax.f32 %v1952_v52, 0.0  ;;  %v1786_v37 = vsub.f32 %v3991_v42, %v4233_v63 }
 0x397   : > { %3097 = vrsqrt.f32 %v1817_v2  ;;  %v1818_v8 = vadd.f32 1e-05, %v1754_v36  ;;  %v4267_v59 = vmul.f32 0.015625, %v1504_v21  ;;  %v1727_v51 = vmul.f32 %v4261_v31, %v4261_v31 }
 0x398   : > { %v1495_v26 = vpop.xlane.xlu0 %1494  ;;  %v1950_v54 = vadd.f32 %v4077_v50, %v1914_v30  ;;  %v2004_v49 = vpack.c.bf16 %v1984_v55, %v1983_v27  ;;  %v1981_v40 = vmax.f32 %v1949_v47, 0.0 }
 0x399   : > { %3099 = vrsqrt.f32 %v1818_v8  ;;  %v4255_v28 = vmul.f32 0.015625, %v1495_v26  ;;  %v1728_v10 = vmul.f32 %v4267_v59, %v4267_v59 }
 0x39a   : > { %v1498_v11 = vpop.xlane.xlu1 %1497  ;;  %v1982_v57 = vmax.f32 %v1950_v54, 0.0 }
 0x39b   : > { %v4257_v12 = vmul.f32 0.015625, %v1498_v11  ;;  %v1725_v48 = vmul.f32 %v4255_v28, %v4255_v28  ;;  %v1789_v26 = vsub.f32 %v4002_v5, %v4255_v28  ;;  %v1792_v5 = vsub.f32 %v4006_v25, %v4267_v59 }
 0x39c   : > { %v1655_v24 = vpop.xlane.xlu0 %1654  ;;  %v2003_v0 = vpack.c.bf16 %v1982_v57, %v1981_v40 }
 0x39d   : > { %v3094_v15 = vpop.eup %3093  ;;  %v1693_v34 = vmul.f32 0.015625, %v1655_v24  ;;  %v1726_v53 = vmul.f32 %v4257_v12, %v4257_v12  ;;  %v1790_v11 = vsub.f32 %v4010_v1, %v4257_v12 }
 0x39e   : > { %2898 = vmatprep.mubr.msk.bf16.mxu0 %vm566_vm1, %v2003_v0  ;;  %v1658_v18 = vpop.xlane.xlu1 %1657  ;;  %v1883_v43 = vmul.f32 %v3094_v15, %v1787_v16  ;;  %v1791_v16 = vsub.f32 %v3998_v62, %v4261_v31 }
 0x39f   : > { %v3096_v56 = vpop.eup %3095  ;;  %v1757_v46 = vsub.f32 %v1693_v34, %v1725_v48  ;;  %v1694_v6 = vmul.f32 0.015625, %v1658_v18  ;;  %2899 = vmatmul.mubr.msk.bf16.gmra.mrb[36].mxu0 %vm566_vm1, %v2004_v49 }
 0x3a0   : > { %v1661_v61 = vpop.xlane.xlu0 %1660  ;;  %v1884_v39 = vmul.f32 %v3096_v56, %v1788_v41  ;;  %v1919_v45 = vmul.f32 %v4073_v35, %v1883_v43 }
 0x3a1   : > { %v3098_v23 = vpop.eup %3097  ;;  %v1821_v13 = vadd.f32 1e-05, %v1757_v46  ;;  %v1758_v38 = vsub.f32 %v1694_v6, %v1726_v53  ;;  %v1695_v60 = vmul.f32 0.015625, %v1661_v61 }
 0x3a2   : > { %v1664_v17 = vpop.xlane.xlu1 %1663  ;;  %v1881_v9 = vmul.f32 %v3098_v23, %v1785_v3  ;;  %v1920_v58 = vmul.f32 %v4073_v35, %v1884_v39  ;;  %v1955_v42 = vadd.f32 %v4077_v50, %v1919_v45  ;;  %v2019_v3 = vsub.s32 4, %v3545_v14 }
 0x3a3   : > { %v3100_v19 = vpop.eup %3099  ;;  %3101 = vrsqrt.f32 %v1821_v13  ;;  %v1822_v63 = vadd.f32 1e-05, %v1758_v38  ;;  %v1759_v20 = vsub.f32 %v1695_v60, %v1727_v51  ;;  %v1696_v32 = vmul.f32 0.015625, %v1664_v17 }
 0x3a4   : > { %v1882_v44 = vmul.f32 %v3100_v19, %v1786_v37  ;;  %v1917_v7 = vmul.f32 %v4073_v35, %v1881_v9  ;;  %v1956_v22 = vadd.f32 %v4077_v50, %v1920_v58  ;;  %v1987_v36 = vmax.f32 %v1955_v42, 0.0 }
 0x3a5   : > { %3103 = vrsqrt.f32 %v1822_v63  ;;  %v1823_v29 = vadd.f32 1e-05, %v1759_v20  ;;  %v1760_v33 = vsub.f32 %v1696_v32, %v1728_v10  ;;  %v4312_v37 = vrot.slane %v4070_v4, %v2019_v3 }
 0x3a6   : > { %v1918_v52 = vmul.f32 %v4073_v35, %v1882_v44  ;;  %v1953_v2 = vadd.f32 %v4077_v50, %v1917_v7  ;;  %v1988_v21 = vmax.f32 %v1956_v22, 0.0 }
 0x3a7   : > { %3105 = vrsqrt.f32 %v1823_v29  ;;  %v1824_v30 = vadd.f32 1e-05, %v1760_v33 }
 0x3a8   : > { %v1954_v47 = vadd.f32 %v4077_v50, %v1918_v52  ;;  %v2006_v27 = vpack.c.bf16 %v1988_v21, %v1987_v36  ;;  %v1985_v55 = vmax.f32 %v1953_v2, 0.0 }
 0x3a9   : > { %3107 = vrsqrt.f32 %v1824_v30 }
 0x3aa   : > { %v1986_v8 = vmax.f32 %v1954_v47, 0.0 }
 0x3ac   : > { %v2005_v54 = vpack.c.bf16 %v1986_v8, %v1985_v55 }
 0x3ad   : > { %v3102_v49 = vpop.eup %3101 }
 0x3ae   : > { %2902 = vmatprep.mubr.msk.bf16.mxu0 %vm566_vm1, %v2005_v54  ;;  %v1885_v40 = vmul.f32 %v3102_v49, %v1789_v26 }
 0x3af   : > { %v3104_v57 = vpop.eup %3103  ;;  %2903 = vmatmul.mubr.msk.bf16.gmra.mrb[40].mxu0 %vm566_vm1, %v2006_v27 }
 0x3b0   : > { %v1886_v24 = vmul.f32 %v3104_v57, %v1790_v11  ;;  %v1921_v0 = vmul.f32 %v4073_v35, %v1885_v40 }
 0x3b1   : > { %v3106_v15 = vpop.eup %3105 }
 0x3b2   : > { %v1887_v28 = vmul.f32 %v3106_v15, %v1791_v16  ;;  %v1922_v48 = vmul.f32 %v4073_v35, %v1886_v24  ;;  %v1957_v1 = vadd.f32 %v4077_v50, %v1921_v0 }
 0x3b3   : > { %v3108_v12 = vpop.eup %3107 }
 0x3b4   : > { %v1888_v34 = vmul.f32 %v3108_v12, %v1792_v5  ;;  %v1958_v41 = vadd.f32 %v4077_v50, %v1922_v48  ;;  %v1923_v18 = vmul.f32 %v4073_v35, %v1887_v28  ;;  %v1989_v62 = vmax.f32 %v1957_v1, 0.0 }
 0x3b6   : > { %v1990_v31 = vmax.f32 %v1958_v41, 0.0  ;;  %v1924_v43 = vmul.f32 %v4073_v35, %v1888_v34  ;;  %v1959_v56 = vadd.f32 %v4077_v50, %v1923_v18 }
 0x3b8   : > { %v2007_v25 = vpack.c.bf16 %v1990_v31, %v1989_v62  ;;  %v1960_v59 = vadd.f32 %v4077_v50, %v1924_v43  ;;  %v1991_v53 = vmax.f32 %v1959_v56, 0.0 }
 0x3ba   : > { %2906 = vmatprep.mubr.msk.bf16.mxu0 %vm566_vm1, %v2007_v25  ;;  %v1992_v46 = vmax.f32 %v1960_v59, 0.0 }
 0x3bc   : > { %v2008_v6 = vpack.c.bf16 %v1992_v46, %v1991_v53 }
 0x3be   : > { %2907 = vmatmul.mubr.msk.bf16.gmra.mrb[44].mxu0 %vm566_vm1, %v2008_v6 }
 0x412   : > { %v2880_v61 = vpop.f32.mrb[16].mxu0 }
 0x413   : > { %v2127_v35 = vpop.f32.mrb[17].mxu0  ;;  %v2136_v50 = vadd.f32 %v2880_v61, %v4312_v37 }
 0x414   : > { %v2881_v39 = vpop.f32.mrb[18].mxu0  ;;  %v2128_v51 = vadd.f32 %v2127_v35, %v4312_v37 }
 0x415   : > { %v2139_v45 = vadd.f32 %v2881_v39, %v4312_v37  ;;  %v2130_v23 = vpop.f32.mrb[19].mxu0 }
 0x416   : > { %v2131_v13 = vadd.f32 %v2130_v23, %v4312_v37 }
 0x417   : > { %v2649_v38 = vpack.c.bf16 %v2139_v45, %v2136_v50 }
 0x418   : > { %v2644_v14 = vpack.c.bf16 %v2131_v13, %v2128_v51 }
 0x419   : > { %2721 = vst [vmem:[%s4320_s26 + $0x8] sm:$0xff] %v2649_v38  }
 0x41a   : > { %2645 = vst [vmem:[%s4320_s26] sm:$0xff] %v2644_v14  }
 0x42e   : > { %v2884_v4 = vpop.f32.mrb[20].mxu0 }
 0x42f   : > { %v2143_v60 = vpop.f32.mrb[21].mxu0  ;;  %v2152_v17 = vadd.f32 %v2884_v4, %v4312_v37 }
 0x430   : > { %v2885_v10 = vpop.f32.mrb[22].mxu0  ;;  %v2144_v42 = vadd.f32 %v2143_v60, %v4312_v37 }
 0x431   : > { %v2155_v9 = vadd.f32 %v2885_v10, %v4312_v37  ;;  %v2146_v58 = vpop.f32.mrb[23].mxu0 }
 0x432   : > { %v2147_v19 = vadd.f32 %v2146_v58, %v4312_v37 }
 0x433   : > { %v2659_v63 = vpack.c.bf16 %v2155_v9, %v2152_v17 }
 0x434   : > { %v2654_v20 = vpack.c.bf16 %v2147_v19, %v2144_v42 }
 0x435   : > { %2723 = vst [vmem:[%s4320_s26 + $0x18] sm:$0xff] %v2659_v63  }
 0x436   : > { %2722 = vst [vmem:[%s4320_s26 + $0x10] sm:$0xff] %v2654_v20  }
 0x442   : > { %v2888_v32 = vpop.f32.mrb[24].mxu0 }
 0x443   : > { %v2159_v44 = vpop.f32.mrb[25].mxu0  ;;  %v2168_v22 = vadd.f32 %v2888_v32, %v4312_v37 }
 0x444   : > { %v2889_v7 = vpop.f32.mrb[26].mxu0  ;;  %v2160_v52 = vadd.f32 %v2159_v44, %v4312_v37 }
 0x445   : > { %v2171_v29 = vadd.f32 %v2889_v7, %v4312_v37  ;;  %v2162_v33 = vpop.f32.mrb[27].mxu0 }
 0x446   : > { %v2163_v2 = vadd.f32 %v2162_v33, %v4312_v37 }
 0x447   : > { %v2669_v36 = vpack.c.bf16 %v2171_v29, %v2168_v22 }
 0x448   : > { %v2664_v21 = vpack.c.bf16 %v2163_v2, %v2160_v52 }
 0x449   : > { %2725 = vst [vmem:[%s4320_s26 + $0x28] sm:$0xff] %v2669_v36  }
 0x44a   : > { %2724 = vst [vmem:[%s4320_s26 + $0x20] sm:$0xff] %v2664_v21  }
 0x452   : > { %v2892_v30 = vpop.f32.mrb[28].mxu0 }
 0x453   : > { %v2175_v47 = vpop.f32.mrb[29].mxu0  ;;  %v2184_v55 = vadd.f32 %v2892_v30, %v4312_v37 }
 0x454   : > { %v2893_v27 = vpop.f32.mrb[30].mxu0  ;;  %v2176_v54 = vadd.f32 %v2175_v47, %v4312_v37 }
 0x455   : > { %v2187_v8 = vadd.f32 %v2893_v27, %v4312_v37  ;;  %v2178_v26 = vpop.f32.mrb[31].mxu0 }
 0x456   : > { %v2179_v49 = vadd.f32 %v2178_v26, %v4312_v37 }
 0x457   : > { %v2679_v11 = vpack.c.bf16 %v2187_v8, %v2184_v55 }
 0x458   : > { %v2674_v40 = vpack.c.bf16 %v2179_v49, %v2176_v54 }
 0x459   : > { %2727 = vst [vmem:[%s4320_s26 + $0x38] sm:$0xff] %v2679_v11  }
 0x45a   : > { %2726 = vst [vmem:[%s4320_s26 + $0x30] sm:$0xff] %v2674_v40  }
 0x462   : > { %v2896_v57 = vpop.f32.mrb[32].mxu0 }
 0x463   : > { %v2191_v16 = vpop.f32.mrb[33].mxu0  ;;  %v2200_v0 = vadd.f32 %v2896_v57, %v4312_v37 }
 0x464   : > { %v2897_v24 = vpop.f32.mrb[34].mxu0  ;;  %v2192_v28 = vadd.f32 %v2191_v16, %v4312_v37 }
 0x465   : > { %v2203_v15 = vadd.f32 %v2897_v24, %v4312_v37  ;;  %v2194_v5 = vpop.f32.mrb[35].mxu0 }
 0x466   : > { %v2195_v48 = vadd.f32 %v2194_v5, %v4312_v37 }
 0x467   : > { %v2689_v1 = vpack.c.bf16 %v2203_v15, %v2200_v0 }
 0x468   : > { %v2684_v12 = vpack.c.bf16 %v2195_v48, %v2192_v28 }
 0x469   : > { %2729 = vst [vmem:[%s4320_s26 + $0x48] sm:$0xff] %v2689_v1  }
 0x46a   : > { %2728 = vst [vmem:[%s4320_s26 + $0x40] sm:$0xff] %v2684_v12  }
 0x472   : > { %v2900_v34 = vpop.f32.mrb[36].mxu0 }
 0x473   : > { %v2207_v41 = vpop.f32.mrb[37].mxu0  ;;  %v2216_v62 = vadd.f32 %v2900_v34, %v4312_v37 }
 0x474   : > { %v2901_v18 = vpop.f32.mrb[38].mxu0  ;;  %v2208_v56 = vadd.f32 %v2207_v41, %v4312_v37 }
 0x475   : > { %v2219_v31 = vadd.f32 %v2901_v18, %v4312_v37  ;;  %v2210_v43 = vpop.f32.mrb[39].mxu0 }
 0x476   : > { %v2211_v25 = vadd.f32 %v2210_v43, %v4312_v37 }
 0x477   : > { %v2699_v59 = vpack.c.bf16 %v2219_v31, %v2216_v62 }
 0x478   : > { %v2694_v53 = vpack.c.bf16 %v2211_v25, %v2208_v56 }
 0x479   : > { %2731 = vst [vmem:[%s4320_s26 + $0x58] sm:$0xff] %v2699_v59  }
 0x47a   : > { %2730 = vst [vmem:[%s4320_s26 + $0x50] sm:$0xff] %v2694_v53  }
 0x482   : > { %v2904_v46 = vpop.f32.mrb[40].mxu0 }
 0x483   : > { %v2223_v6 = vpop.f32.mrb[41].mxu0  ;;  %v2232_v61 = vadd.f32 %v2904_v46, %v4312_v37 }
 0x484   : > { %v2905_v3 = vpop.f32.mrb[42].mxu0  ;;  %v2224_v50 = vadd.f32 %v2223_v6, %v4312_v37 }
 0x485   : > { %v2235_v35 = vadd.f32 %v2905_v3, %v4312_v37  ;;  %v2226_v39 = vpop.f32.mrb[43].mxu0 }
 0x486   : > { %v2227_v45 = vadd.f32 %v2226_v39, %v4312_v37 }
 0x487   : > { %v2709_v23 = vpack.c.bf16 %v2235_v35, %v2232_v61 }
 0x488   : > { %v2704_v51 = vpack.c.bf16 %v2227_v45, %v2224_v50 }
 0x489   : > { %2733 = vst [vmem:[%s4320_s26 + $0x68] sm:$0xff] %v2709_v23  }
 0x48a   : > { %2732 = vst [vmem:[%s4320_s26 + $0x60] sm:$0xff] %v2704_v51  }
 0x491   : > { %v2908_v13 = vpop.f32.mrb[44].mxu0 }
 0x492   : > { %v2239_v38 = vpop.f32.mrb[45].mxu0  ;;  %v2248_v4 = vadd.f32 %v2908_v13, %v4312_v37 }
 0x493   : > { %v2909_v14 = vpop.f32.mrb[46].mxu0  ;;  %v2240_v17 = vadd.f32 %v2239_v38, %v4312_v37 }
 0x494   : > { %v2251_v60 = vadd.f32 %v2909_v14, %v4312_v37  ;;  %v2242_v10 = vpop.f32.mrb[47].mxu0 }
 0x495   : > { %v2243_v9 = vadd.f32 %v2242_v10, %v4312_v37 }
 0x496   : > { %v2719_v58 = vpack.c.bf16 %v2251_v60, %v2248_v4 }
 0x497   : > { %v2714_v42 = vpack.c.bf16 %v2243_v9, %v2240_v17 }
 0x498   : > { %2735 = vst [vmem:[%s4320_s26 + $0x78] sm:$0xff] %v2719_v58  }
 0x499   : > { %2734 = vst [vmem:[%s4320_s26 + $0x70] sm:$0xff] %v2714_v42  }
 0x49a   : > { %3123 = shalt.err (!%p3120_p3)
}
 0x49b   : > { %s3124_s14 = scalar_lea.hbm %s4369_s9, 2048  ;;  %s3128_s17 = scalar_lea.hbm %s4423_s5, 4096 }
 0x49c   : > { %p3125_p4 = scmp.ne.s32.totalorder %s4369_s9, %s3124_s14  ;;  %p3129_p9 = scmp.lt.u32.totalorder %s4369_s9, %s4423_s5 }
 0x49d   : > { %p3130_p10 = scmp.lt.u32.totalorder %s3128_s17, %s3124_s14  ;;  %p3132_p12 = scmp.lt.u32.totalorder %s3124_s14, %s4369_s9 }
 0x49e   : > { %p3126_p7 = pnand %p3125_p4, %p3245_p5 }
 0x49f   : > { %p3131_p11 = por %p3130_p10, %p3129_p9 }
 0x4a0   : > { %p3127_p8 = pneg %p3126_p7 }
 0x4a1   : > { %p3133_p13 = por %p3132_p12, %p3131_p11 }
 0x4a3   : > { %p3134_p0 = pnand %p3133_p13, %p3127_p8 }
 0x4a5   : > { %3137 = shalt.err (!%p3134_p0)
}
 0x4a6   : > { %s3175_s26 = smov 64   ;;  %s3176_s30 = smov 4  }
 0x4a7   : > { %2914 = dma.vmem_to_hbm [thread:$0]  (%p3245_p5), %s4371_s6, 2048, %s4369_s9, %s4377_s22, %s3175_s26, %s3175_s26, %s3176_s30  }
 0x4a8 PF: > { %p2920_p1 = scmp.ge.s32.totalorder %s3172_s21, 2  ;;  %s2443_s7 = sand.u32 1, %s3160_s18  }
 0x4a9   : > { %s2444_s8 = scalar_lea.sflag [#allocation3], %s2443_s7 }
 0x4aa   : > { %p2917_p2 = pnand %p2920_p1, %p3249_p6 }
 0x4ac   : > { %3155 = dma.done.wait (!%p2917_p2), %s2444_s8, 2048  }
 0x4ad   : > { %3157 = vsyncadd (!%p2917_p2), %s2444_s8, 4294965248  ;;  %p15_p3 = scmp.ge.s32.totalorder %s3232_s24, 4   ;;  %s4426_s18 = smov %s3164_s19 }
 0x4ae   : > { %s4427_s19 = smov %s3168_s20  ;;  %s4428_s20 = smov %s3243_s27 }
 0x4af   : > { %s4429_s21 = smov %s3232_s24  ;;  %17 = sbr.rel (!%p15_p3) target bundleno = 3 (0x3), region = 75 }
 0x4b6   :  { %2449 = vsyncpa [#allocation3], 1 }
 0x4b7   :  { %2451 = vsyncpa [#allocation3 + $0x1], 1 }

</bundles_post_ra>
